<compile_context>
chip_gen: v5e
topology: v5e:2x2
jax: 0.10.0
libtpu: 0.0.40
codegen_flags: <defaults>
</compile_context>

<pallas_src>
import functools

import jax
import jax.numpy as jnp
import numpy as np
from jax import lax
from jax.experimental import pallas as pl
from jax.experimental.pallas import tpu as pltpu


def _bottleneck_kernel(H, W, btile,
                       x_ref, w1_ref, b1_ref, w2_ref, b2_ref, w3_ref, b3_ref,
                       mcl_ref, mcr_ref, mru_ref, mrd_ref,
                       o_ref,
                       slab_ref):
    HW = H * W
    M = btile * HW
    cpad = w1_ref.shape[1]

    x = x_ref[...]                                                 # (M, Cin) f32

    # ---- conv1 (1x1, BN1 scale folded into w1) + bias + relu -> (M, Cpad) f32
    y1 = jnp.dot(x.astype(jnp.bfloat16), w1_ref[...],
                 preferred_element_type=jnp.float32)
    y1 = jnp.maximum(y1 + b1_ref[...], 0.0)

    # ---- conv2 (3x3, pad=1, stride=1): build the im2col slab in bf16 scratch.
    # tap(dy,dx)[g] = y1[g + dy*W + dx], zeroed where (r+dy, c+dx) leaves the image.
    # Shifts are full-tile rolls over the flattened batch*H*W rows; any mod-M wrap or
    # cross-image bleed only occurs at rows where the row/col mask is already zero.
    mcl = mcl_ref[...]   # (M,1) f32: c > 0      (dx = -1 valid)
    mcr = mcr_ref[...]   # (M,1) f32: c < W-1    (dx = +1 valid)
    mru = mru_ref[...]   # (M,1) f32: r > 0      (dy = -1 valid)
    mrd = mrd_ref[...]   # (M,1) f32: r < H-1    (dy = +1 valid)

    base = {
        -1: pltpu.roll(y1, 1, 0) * mcl,        # y1[g-1], zeroed at c == 0
        0: y1,
        1: pltpu.roll(y1, M - 1, 0) * mcr,     # y1[g+1], zeroed at c == W-1
    }
    for dy in (-1, 0, 1):
        rmask = {-1: mru, 0: None, 1: mrd}[dy]
        for dx in (-1, 0, 1):
            t = (dy + 1) * 3 + (dx + 1)        # tap order matches w2k row blocks
            tap = base[dx]
            if dy != 0:
                tap = pltpu.roll(tap, (-dy * W) % M, 0) * rmask    # roll by W: cheap (sublane-aligned)
            slab_ref[:, pl.ds(t * cpad, cpad)] = tap.astype(jnp.bfloat16)

    # ---- conv2 as one im2col matmul, K = 9*Cpad, + bias + relu
    y2 = jnp.dot(slab_ref[...], w2_ref[...], preferred_element_type=jnp.float32)
    y2 = jnp.maximum(y2 + b2_ref[...], 0.0)                        # (M, Cpad) f32

    # ---- conv3 (1x1, BN3 scale folded into w3) + bias, residual add (identity), relu
    y3 = jnp.dot(y2.astype(jnp.bfloat16), w3_ref[...],
                 preferred_element_type=jnp.float32)
    o_ref[...] = jnp.maximum(y3 + b3_ref[...] + x, 0.0)


def _full_spec(arr):
    nd = arr.ndim
    return pl.BlockSpec(arr.shape, lambda n, _nd=nd: (0,) * _nd)


def bottleneck_forward(x_nchw, kparams, H, W, max_rows=1024):
    """x_nchw: (N, Cin, H, W) float32.  Returns (N, Cout, H, W) float32."""
    N, Cin = x_nchw.shape[0], x_nchw.shape[1]
    w1k, b1, w2k, b2, w3k, b3 = kparams
    Cpad = w1k.shape[1]
    Cout = w3k.shape[1]
    HW = H * W

    if Cin != Cout:
        raise ValueError(
            "Identity-shortcut Bottleneck requires in_channels == out_channels * 4 "
            f"(got Cin={Cin}, Cout={Cout}); the downsample/stride path is not implemented.")

    # Pack B_TILE images per grid step so M = B_TILE*HW fills the MXU M dimension at small
    # spatial sizes; falls back to 1 image/step at large HW (VMEM-bounded).
    btile = 1
    for d in range(N, 0, -1):
        if N % d == 0 and d * HW <= max_rows:
            btile = d
            break
    M = btile * HW
    grid = (N // btile,)

    # NCHW -> (N*H*W, C) channels-last, flattened batch+spatial.
    x2 = jnp.transpose(x_nchw, (0, 2, 3, 1)).reshape(N * HW, Cin)

    # Row/column validity masks for the 3x3 taps, precomputed once (no in-kernel iota/div/mod).
    idx = jnp.arange(HW, dtype=jnp.int32)
    col, row = idx % W, idx // W

    def mk(m):
        return jnp.tile(m.astype(jnp.float32), (btile,))[:, None]   # (M, 1)

    mcl, mcr = mk(col > 0), mk(col < W - 1)
    mru, mrd = mk(row > 0), mk(row < H - 1)

    # Per-step VMEM budget: double-buffered activation I/O + weights + bf16 slab + f32 temps.
    est = (2 * M * Cin * 4 + 2 * M * Cout * 4
           + 2 * 2 * (w1k.size + w2k.size + w3k.size)
           + M * 9 * Cpad * 2
           + 10 * M * Cpad * 4)
    vmem_limit = int(min(64 * 1024 * 1024, est + (16 << 20)))

    kern = functools.partial(_bottleneck_kernel, H, W, btile)
    out = pl.pallas_call(
        kern,
        out_shape=jax.ShapeDtypeStruct((N * HW, Cout), jnp.float32),
        grid=grid,
        in_specs=[pl.BlockSpec((M, Cin), lambda n: (n, 0)),
                  _full_spec(w1k), _full_spec(b1),
                  _full_spec(w2k), _full_spec(b2),
                  _full_spec(w3k), _full_spec(b3),
                  _full_spec(mcl), _full_spec(mcr),
                  _full_spec(mru), _full_spec(mrd)],
        out_specs=pl.BlockSpec((M, Cout), lambda n: (n, 0)),
        scratch_shapes=[pltpu.VMEM((M, 9 * Cpad), jnp.bfloat16)],
        compiler_params=pltpu.CompilerParams(
            dimension_semantics=("parallel",),
            vmem_limit_bytes=vmem_limit),
    )(x2, w1k, b1, w2k, b2, w3k, b3, mcl, mcr, mru, mrd)

    # (N*H*W, Cout) -> NCHW
    return jnp.transpose(out.reshape(N, H, W, Cout), (0, 3, 1, 2))


# -------------------- deterministic parameter construction --------------------

def init_raw_params(key, in_channels, out_channels, expansion=4):
    Cin, Cmid, Cout = in_channels, out_channels, out_channels * expansion
    keys = iter(jax.random.split(key, 24))

    def conv_init(co, ci, kh, kw):
        bound = 1.0 / np.sqrt(ci * kh * kw)
        w = jax.random.uniform(next(keys), (co, ci, kh, kw), jnp.float32, -bound, bound)
        b = jax.random.uniform(next(keys), (co,), jnp.float32, -bound, bound)
        return w, b

    def bn_init(c):
        gamma = jax.random.uniform(next(keys), (c,), jnp.float32, 0.5, 1.5)
        beta = jax.random.uniform(next(keys), (c,), jnp.float32, -0.3, 0.3)
        mean = jax.random.uniform(next(keys), (c,), jnp.float32, -0.2, 0.2)
        var = jax.random.uniform(next(keys), (c,), jnp.float32, 0.5, 1.5)
        return (gamma, beta, mean, var)

    w1, cb1 = conv_init(Cmid, Cin, 1, 1); bn1 = bn_init(Cmid)
    w2, cb2 = conv_init(Cmid, Cmid, 3, 3); bn2 = bn_init(Cmid)
    w3, cb3 = conv_init(Cout, Cmid, 1, 1); bn3 = bn_init(Cout)
    return (w1, cb1, bn1, w2, cb2, bn2, w3, cb3, bn3)


def fold_kernel_params(raw, eps=1e-5, lane=128):
    """Fold eval-mode BN (scale into weights, rest into bias), zero-pad Cmid to a
    128-lane multiple, cast weights to bf16.  Padded lanes stay exactly zero."""
    (w1, cb1, bn1, w2, cb2, bn2, w3, cb3, bn3) = raw
    Cin = w1.shape[1]
    Cmid = w2.shape[0]
    Cout = w3.shape[0]
    Cpad = ((Cmid + lane - 1) // lane) * lane

    def scale_bias(cb, bnp):
        gamma, beta, mean, var = bnp
        scale = gamma / jnp.sqrt(var + eps)
        bias = (cb - mean) * scale + beta
        return scale, bias

    s1, bias1 = scale_bias(cb1, bn1)
    s2, bias2 = scale_bias(cb2, bn2)
    s3, bias3 = scale_bias(cb3, bn3)

    # conv1: (Cmid, Cin, 1, 1) -> (Cin, Cpad), BN scale folded; padded output columns zero.
    w1m = jnp.transpose(w1[:, :, 0, 0]) * s1[None, :]                      # (Cin, Cmid)
    w1k = jnp.zeros((Cin, Cpad), jnp.float32).at[:, :Cmid].set(w1m).astype(jnp.bfloat16)
    b1 = jnp.zeros((1, Cpad), jnp.float32).at[0, :Cmid].set(bias1)

    # conv2: (O, I, 3, 3) -> (kh, kw, I, O) -> (9*Cpad, Cpad) im2col weight (tap-major rows).
    w2m = jnp.transpose(w2, (2, 3, 1, 0)) * s2[None, None, None, :]        # (3,3,Cmid,Cmid)
    w2p = jnp.zeros((3, 3, Cpad, Cpad), jnp.float32).at[:, :, :Cmid, :Cmid].set(w2m)
    w2k = w2p.reshape(9 * Cpad, Cpad).astype(jnp.bfloat16)
    b2 = jnp.zeros((1, Cpad), jnp.float32).at[0, :Cmid].set(bias2)

    # conv3: (Cout, Cmid, 1, 1) -> (Cpad, Cout); padded input rows zero.
    w3m = jnp.transpose(w3[:, :, 0, 0]) * s3[None, :]                      # (Cmid, Cout)
    w3k = jnp.zeros((Cpad, Cout), jnp.float32).at[:Cmid, :].set(w3m).astype(jnp.bfloat16)
    b3 = bias3[None, :]

    return (w1k, b1, w2k, b2, w3k, b3)


# -------------------- pure-JAX reference (PyTorch NCHW semantics) --------------------

def reference_forward(x, raw, eps=1e-5):
    (w1, cb1, bn1, w2, cb2, bn2, w3, cb3, bn3) = raw

    def conv(x, w, b, stride, pad):
        y = lax.conv_general_dilated(
            x, w, window_strides=(stride, stride),
            padding=[(pad, pad), (pad, pad)],
            dimension_numbers=("NCHW", "OIHW", "NCHW"),
            precision=lax.Precision.HIGHEST)
        return y + b[None, :, None, None]

    def bn(x, p):
        gamma, beta, mean, var = p
        scale = (gamma / jnp.sqrt(var + eps))[None, :, None, None]
        return (x - mean[None, :, None, None]) * scale + beta[None, :, None, None]

    identity = x
    y = jax.nn.relu(bn(conv(x, w1, cb1, 1, 0), bn1))
    y = jax.nn.relu(bn(conv(y, w2, cb2, 1, 1), bn2))
    y = bn(conv(y, w3, cb3, 1, 0), bn3)
    return jax.nn.relu(y + identity)


if __name__ == "__main__":
    key = jax.random.PRNGKey(0)
    N, H, W = 2, 8, 8
    out_channels = 32
    in_channels = out_channels * 4          # identity residual requires Cin == Cout*4

    kx, kp = jax.random.split(key)
    x = jax.random.normal(kx, (N, in_channels, H, W), jnp.float32)

    raw = init_raw_params(kp, in_channels, out_channels)
    kparams = fold_kernel_params(raw)

    y = bottleneck_forward(x, kparams, H, W)
    y = jax.block_until_ready(y)

    # Reference is full-f32 HIGHEST precision; the kernel uses bf16 MXU operands with
    # f32 accumulation, so compare with bf16-aware bounds.
    y_ref = reference_forward(x, raw)
    if not np.allclose(np.asarray(y), np.asarray(y_ref), rtol=3e-2, atol=3e-2):
        raise AssertionError(
            "Pallas bottleneck mismatch; max abs err = "
            f"{float(np.max(np.abs(np.asarray(y) - np.asarray(y_ref))))}")

    print("KERNEL_OK")
</pallas_src>

<mosaic_0001>
module attributes {stable_mosaic.version = 11 : i64} {
  func.func @_bottleneck_kernel(%arg0: i32, %arg1: memref<128x128xf32, #tpu.memory_space<vmem>>, %arg2: memref<128x128xbf16, #tpu.memory_space<vmem>>, %arg3: memref<1x128xf32, #tpu.memory_space<vmem>>, %arg4: memref<1152x128xbf16, #tpu.memory_space<vmem>>, %arg5: memref<1x128xf32, #tpu.memory_space<vmem>>, %arg6: memref<128x128xbf16, #tpu.memory_space<vmem>>, %arg7: memref<1x128xf32, #tpu.memory_space<vmem>>, %arg8: memref<128x1xf32, #tpu.memory_space<vmem>>, %arg9: memref<128x1xf32, #tpu.memory_space<vmem>>, %arg10: memref<128x1xf32, #tpu.memory_space<vmem>>, %arg11: memref<128x1xf32, #tpu.memory_space<vmem>>, %arg12: memref<128x128xf32, #tpu.memory_space<vmem>>, %arg13: memref<128x1152xbf16, #tpu.memory_space<vmem>>) attributes {dimension_semantics = [#tpu.dimension_semantics<parallel>], iteration_bounds = array<i64: 1>, scalar_prefetch = 0 : i64, scratch_operands = 1 : i64, tpu.core_type = #tpu.core_type<tc>, window_params = [{transform_indices = @transform_0, window_bounds = array<i64: 128, 128>}, {pipeline_mode = #tpu.pipeline_mode<synchronous>, transform_indices = @transform_1, window_bounds = array<i64: 128, 128>}, {pipeline_mode = #tpu.pipeline_mode<synchronous>, transform_indices = @transform_2, window_bounds = array<i64: 1, 128>}, {pipeline_mode = #tpu.pipeline_mode<synchronous>, transform_indices = @transform_3, window_bounds = array<i64: 1152, 128>}, {pipeline_mode = #tpu.pipeline_mode<synchronous>, transform_indices = @transform_4, window_bounds = array<i64: 1, 128>}, {pipeline_mode = #tpu.pipeline_mode<synchronous>, transform_indices = @transform_5, window_bounds = array<i64: 128, 128>}, {pipeline_mode = #tpu.pipeline_mode<synchronous>, transform_indices = @transform_6, window_bounds = array<i64: 1, 128>}, {pipeline_mode = #tpu.pipeline_mode<synchronous>, transform_indices = @transform_7, window_bounds = array<i64: 128, 1>}, {pipeline_mode = #tpu.pipeline_mode<synchronous>, transform_indices = @transform_8, window_bounds = array<i64: 128, 1>}, {pipeline_mode = #tpu.pipeline_mode<synchronous>, transform_indices = @transform_9, window_bounds = array<i64: 128, 1>}, {pipeline_mode = #tpu.pipeline_mode<synchronous>, transform_indices = @transform_10, window_bounds = array<i64: 128, 1>}, {transform_indices = @transform_11, window_bounds = array<i64: 128, 128>}]} {
    %c0 = arith.constant 0 : index
    %c0_0 = arith.constant 0 : index
    %0 = vector.load %arg1[%c0, %c0_0] : memref<128x128xf32, #tpu.memory_space<vmem>>, vector<128x128xf32>
    %1 = arith.truncf %0 : vector<128x128xf32> to vector<128x128xbf16>
    %c0_1 = arith.constant 0 : index
    %c0_2 = arith.constant 0 : index
    %2 = vector.load %arg2[%c0_1, %c0_2] : memref<128x128xbf16, #tpu.memory_space<vmem>>, vector<128x128xbf16>
    %cst = arith.constant dense<0.000000e+00> : vector<128x128xf32>
    %3 = tpu.matmul %1, %2, %cst {dimension_numbers = #tpu.dot_dimension_numbers<[1], [0], [0], [1], [0, 0, 1, 1], [], []>} : vector<128x128xbf16>, vector<128x128xbf16>, vector<128x128xf32> -> vector<128x128xf32>
    %c0_3 = arith.constant 0 : index
    %c0_4 = arith.constant 0 : index
    %4 = vector.load %arg3[%c0_3, %c0_4] : memref<1x128xf32, #tpu.memory_space<vmem>>, vector<1x128xf32>
    %5 = vector.broadcast %4 : vector<1x128xf32> to vector<128x128xf32>
    %6 = arith.addf %3, %5 : vector<128x128xf32>
    %cst_5 = arith.constant 0.000000e+00 : f32
    %7 = vector.broadcast %cst_5 : f32 to vector<128x128xf32>
    %8 = arith.maximumf %6, %7 : vector<128x128xf32>
    %c0_6 = arith.constant 0 : index
    %c0_7 = arith.constant 0 : index
    %9 = vector.load %arg8[%c0_6, %c0_7] : memref<128x1xf32, #tpu.memory_space<vmem>>, vector<128x1xf32>
    %c0_8 = arith.constant 0 : index
    %c0_9 = arith.constant 0 : index
    %10 = vector.load %arg9[%c0_8, %c0_9] : memref<128x1xf32, #tpu.memory_space<vmem>>, vector<128x1xf32>
    %c0_10 = arith.constant 0 : index
    %c0_11 = arith.constant 0 : index
    %11 = vector.load %arg10[%c0_10, %c0_11] : memref<128x1xf32, #tpu.memory_space<vmem>>, vector<128x1xf32>
    %c0_12 = arith.constant 0 : index
    %c0_13 = arith.constant 0 : index
    %12 = vector.load %arg11[%c0_12, %c0_13] : memref<128x1xf32, #tpu.memory_space<vmem>>, vector<128x1xf32>
    %c1_i32 = arith.constant 1 : i32
    %13 = tpu.dynamic_rotate %8 by %c1_i32 dim 0 : vector<128x128xf32>, i32 -> vector<128x128xf32>
    %14 = vector.broadcast %9 : vector<128x1xf32> to vector<128x128xf32>
    %15 = arith.mulf %13, %14 : vector<128x128xf32>
    %c127_i32 = arith.constant 127 : i32
    %16 = tpu.dynamic_rotate %8 by %c127_i32 dim 0 : vector<128x128xf32>, i32 -> vector<128x128xf32>
    %17 = vector.broadcast %10 : vector<128x1xf32> to vector<128x128xf32>
    %18 = arith.mulf %16, %17 : vector<128x128xf32>
    %c8_i32 = arith.constant 8 : i32
    %19 = tpu.dynamic_rotate %15 by %c8_i32 dim 0 : vector<128x128xf32>, i32 -> vector<128x128xf32>
    %20 = vector.broadcast %11 : vector<128x1xf32> to vector<128x128xf32>
    %21 = arith.mulf %19, %20 : vector<128x128xf32>
    %22 = arith.truncf %21 : vector<128x128xf32> to vector<128x128xbf16>
    %c0_14 = arith.constant 0 : index
    %c0_15 = arith.constant 0 : index
    %23 = vector.load %arg13[%c0_14, %c0_15] : memref<128x1152xbf16, #tpu.memory_space<vmem>>, vector<128x128xbf16>
    tpu.vector_store %arg13[%c0_14, %c0_15], %22 {strides = array<i32>} : memref<128x1152xbf16, #tpu.memory_space<vmem>>, vector<128x128xbf16>,
    %c8_i32_16 = arith.constant 8 : i32
    %24 = tpu.dynamic_rotate %8 by %c8_i32_16 dim 0 : vector<128x128xf32>, i32 -> vector<128x128xf32>
    %25 = vector.broadcast %11 : vector<128x1xf32> to vector<128x128xf32>
    %26 = arith.mulf %24, %25 : vector<128x128xf32>
    %27 = arith.truncf %26 : vector<128x128xf32> to vector<128x128xbf16>
    %c0_17 = arith.constant 0 : index
    %c128 = arith.constant 128 : index
    %28 = vector.load %arg13[%c0_17, %c128] : memref<128x1152xbf16, #tpu.memory_space<vmem>>, vector<128x128xbf16>
    tpu.vector_store %arg13[%c0_17, %c128], %27 {strides = array<i32>} : memref<128x1152xbf16, #tpu.memory_space<vmem>>, vector<128x128xbf16>,
    %c8_i32_18 = arith.constant 8 : i32
    %29 = tpu.dynamic_rotate %18 by %c8_i32_18 dim 0 : vector<128x128xf32>, i32 -> vector<128x128xf32>
    %30 = vector.broadcast %11 : vector<128x1xf32> to vector<128x128xf32>
    %31 = arith.mulf %29, %30 : vector<128x128xf32>
    %32 = arith.truncf %31 : vector<128x128xf32> to vector<128x128xbf16>
    %c0_19 = arith.constant 0 : index
    %c256 = arith.constant 256 : index
    %33 = vector.load %arg13[%c0_19, %c256] : memref<128x1152xbf16, #tpu.memory_space<vmem>>, vector<128x128xbf16>
    tpu.vector_store %arg13[%c0_19, %c256], %32 {strides = array<i32>} : memref<128x1152xbf16, #tpu.memory_space<vmem>>, vector<128x128xbf16>,
    %34 = arith.truncf %15 : vector<128x128xf32> to vector<128x128xbf16>
    %c0_20 = arith.constant 0 : index
    %c384 = arith.constant 384 : index
    %35 = vector.load %arg13[%c0_20, %c384] : memref<128x1152xbf16, #tpu.memory_space<vmem>>, vector<128x128xbf16>
    tpu.vector_store %arg13[%c0_20, %c384], %34 {strides = array<i32>} : memref<128x1152xbf16, #tpu.memory_space<vmem>>, vector<128x128xbf16>,
    %36 = arith.truncf %8 : vector<128x128xf32> to vector<128x128xbf16>
    %c0_21 = arith.constant 0 : index
    %c512 = arith.constant 512 : index
    %37 = vector.load %arg13[%c0_21, %c512] : memref<128x1152xbf16, #tpu.memory_space<vmem>>, vector<128x128xbf16>
    tpu.vector_store %arg13[%c0_21, %c512], %36 {strides = array<i32>} : memref<128x1152xbf16, #tpu.memory_space<vmem>>, vector<128x128xbf16>,
    %38 = arith.truncf %18 : vector<128x128xf32> to vector<128x128xbf16>
    %c0_22 = arith.constant 0 : index
    %c640 = arith.constant 640 : index
    %39 = vector.load %arg13[%c0_22, %c640] : memref<128x1152xbf16, #tpu.memory_space<vmem>>, vector<128x128xbf16>
    tpu.vector_store %arg13[%c0_22, %c640], %38 {strides = array<i32>} : memref<128x1152xbf16, #tpu.memory_space<vmem>>, vector<128x128xbf16>,
    %c120_i32 = arith.constant 120 : i32
    %40 = tpu.dynamic_rotate %15 by %c120_i32 dim 0 : vector<128x128xf32>, i32 -> vector<128x128xf32>
    %41 = vector.broadcast %12 : vector<128x1xf32> to vector<128x128xf32>
    %42 = arith.mulf %40, %41 : vector<128x128xf32>
    %43 = arith.truncf %42 : vector<128x128xf32> to vector<128x128xbf16>
    %c0_23 = arith.constant 0 : index
    %c768 = arith.constant 768 : index
    %44 = vector.load %arg13[%c0_23, %c768] : memref<128x1152xbf16, #tpu.memory_space<vmem>>, vector<128x128xbf16>
    tpu.vector_store %arg13[%c0_23, %c768], %43 {strides = array<i32>} : memref<128x1152xbf16, #tpu.memory_space<vmem>>, vector<128x128xbf16>,
    %c120_i32_24 = arith.constant 120 : i32
    %45 = tpu.dynamic_rotate %8 by %c120_i32_24 dim 0 : vector<128x128xf32>, i32 -> vector<128x128xf32>
    %46 = vector.broadcast %12 : vector<128x1xf32> to vector<128x128xf32>
    %47 = arith.mulf %45, %46 : vector<128x128xf32>
    %48 = arith.truncf %47 : vector<128x128xf32> to vector<128x128xbf16>
    %c0_25 = arith.constant 0 : index
    %c896 = arith.constant 896 : index
    %49 = vector.load %arg13[%c0_25, %c896] : memref<128x1152xbf16, #tpu.memory_space<vmem>>, vector<128x128xbf16>
    tpu.vector_store %arg13[%c0_25, %c896], %48 {strides = array<i32>} : memref<128x1152xbf16, #tpu.memory_space<vmem>>, vector<128x128xbf16>,
    %c120_i32_26 = arith.constant 120 : i32
    %50 = tpu.dynamic_rotate %18 by %c120_i32_26 dim 0 : vector<128x128xf32>, i32 -> vector<128x128xf32>
    %51 = vector.broadcast %12 : vector<128x1xf32> to vector<128x128xf32>
    %52 = arith.mulf %50, %51 : vector<128x128xf32>
    %53 = arith.truncf %52 : vector<128x128xf32> to vector<128x128xbf16>
    %c0_27 = arith.constant 0 : index
    %c1024 = arith.constant 1024 : index
    %54 = vector.load %arg13[%c0_27, %c1024] : memref<128x1152xbf16, #tpu.memory_space<vmem>>, vector<128x128xbf16>
    tpu.vector_store %arg13[%c0_27, %c1024], %53 {strides = array<i32>} : memref<128x1152xbf16, #tpu.memory_space<vmem>>, vector<128x128xbf16>,
    %c0_28 = arith.constant 0 : index
    %c0_29 = arith.constant 0 : index
    %55 = vector.load %arg13[%c0_28, %c0_29] : memref<128x1152xbf16, #tpu.memory_space<vmem>>, vector<128x1152xbf16>
    %c0_30 = arith.constant 0 : index
    %c0_31 = arith.constant 0 : index
    %56 = vector.load %arg4[%c0_30, %c0_31] : memref<1152x128xbf16, #tpu.memory_space<vmem>>, vector<1152x128xbf16>
    %cst_32 = arith.constant dense<0.000000e+00> : vector<128x128xf32>
    %57 = tpu.matmul %55, %56, %cst_32 {dimension_numbers = #tpu.dot_dimension_numbers<[1], [0], [0], [1], [0, 0, 1, 1], [], []>} : vector<128x1152xbf16>, vector<1152x128xbf16>, vector<128x128xf32> -> vector<128x128xf32>
    %c0_33 = arith.constant 0 : index
    %c0_34 = arith.constant 0 : index
    %58 = vector.load %arg5[%c0_33, %c0_34] : memref<1x128xf32, #tpu.memory_space<vmem>>, vector<1x128xf32>
    %59 = vector.broadcast %58 : vector<1x128xf32> to vector<128x128xf32>
    %60 = arith.addf %57, %59 : vector<128x128xf32>
    %cst_35 = arith.constant 0.000000e+00 : f32
    %61 = vector.broadcast %cst_35 : f32 to vector<128x128xf32>
    %62 = arith.maximumf %60, %61 : vector<128x128xf32>
    %63 = arith.truncf %62 : vector<128x128xf32> to vector<128x128xbf16>
    %c0_36 = arith.constant 0 : index
    %c0_37 = arith.constant 0 : index
    %64 = vector.load %arg6[%c0_36, %c0_37] : memref<128x128xbf16, #tpu.memory_space<vmem>>, vector<128x128xbf16>
    %cst_38 = arith.constant dense<0.000000e+00> : vector<128x128xf32>
    %65 = tpu.matmul %63, %64, %cst_38 {dimension_numbers = #tpu.dot_dimension_numbers<[1], [0], [0], [1], [0, 0, 1, 1], [], []>} : vector<128x128xbf16>, vector<128x128xbf16>, vector<128x128xf32> -> vector<128x128xf32>
    %c0_39 = arith.constant 0 : index
    %c0_40 = arith.constant 0 : index
    %66 = vector.load %arg7[%c0_39, %c0_40] : memref<1x128xf32, #tpu.memory_space<vmem>>, vector<1x128xf32>
    %67 = vector.broadcast %66 : vector<1x128xf32> to vector<128x128xf32>
    %68 = arith.addf %65, %67 : vector<128x128xf32>
    %69 = arith.addf %68, %0 : vector<128x128xf32>
    %cst_41 = arith.constant 0.000000e+00 : f32
    %70 = vector.broadcast %cst_41 : f32 to vector<128x128xf32>
    %71 = arith.maximumf %69, %70 : vector<128x128xf32>
    %c0_42 = arith.constant 0 : index
    %c0_43 = arith.constant 0 : index
    %72 = vector.load %arg12[%c0_42, %c0_43] : memref<128x128xf32, #tpu.memory_space<vmem>>, vector<128x128xf32>
    tpu.vector_store %arg12[%c0_42, %c0_43], %71 {strides = array<i32>} : memref<128x128xf32, #tpu.memory_space<vmem>>, vector<128x128xf32>,
    return
  }
  func.func @transform_0(%arg0: i32) -> (i32, i32) {
    %c0_i32 = arith.constant 0 : i32
    %c0_i32_0 = arith.constant 0 : i32
    return %arg0, %c0_i32 : i32, i32
  }
  func.func @transform_1(%arg0: i32) -> (i32, i32) {
    %c0_i32 = arith.constant 0 : i32
    %c0_i32_0 = arith.constant 0 : i32
    %c0_i32_1 = arith.constant 0 : i32
    return %c0_i32, %c0_i32_0 : i32, i32
  }
  func.func @transform_2(%arg0: i32) -> (i32, i32) {
    %c0_i32 = arith.constant 0 : i32
    %c0_i32_0 = arith.constant 0 : i32
    %c0_i32_1 = arith.constant 0 : i32
    return %c0_i32, %c0_i32_0 : i32, i32
  }
  func.func @transform_3(%arg0: i32) -> (i32, i32) {
    %c0_i32 = arith.constant 0 : i32
    %c0_i32_0 = arith.constant 0 : i32
    %c0_i32_1 = arith.constant 0 : i32
    return %c0_i32, %c0_i32_0 : i32, i32
  }
  func.func @transform_4(%arg0: i32) -> (i32, i32) {
    %c0_i32 = arith.constant 0 : i32
    %c0_i32_0 = arith.constant 0 : i32
    %c0_i32_1 = arith.constant 0 : i32
    return %c0_i32, %c0_i32_0 : i32, i32
  }
  func.func @transform_5(%arg0: i32) -> (i32, i32) {
    %c0_i32 = arith.constant 0 : i32
    %c0_i32_0 = arith.constant 0 : i32
    %c0_i32_1 = arith.constant 0 : i32
    return %c0_i32, %c0_i32_0 : i32, i32
  }
  func.func @transform_6(%arg0: i32) -> (i32, i32) {
    %c0_i32 = arith.constant 0 : i32
    %c0_i32_0 = arith.constant 0 : i32
    %c0_i32_1 = arith.constant 0 : i32
    return %c0_i32, %c0_i32_0 : i32, i32
  }
  func.func @transform_7(%arg0: i32) -> (i32, i32) {
    %c0_i32 = arith.constant 0 : i32
    %c0_i32_0 = arith.constant 0 : i32
    %c0_i32_1 = arith.constant 0 : i32
    return %c0_i32, %c0_i32_0 : i32, i32
  }
  func.func @transform_8(%arg0: i32) -> (i32, i32) {
    %c0_i32 = arith.constant 0 : i32
    %c0_i32_0 = arith.constant 0 : i32
    %c0_i32_1 = arith.constant 0 : i32
    return %c0_i32, %c0_i32_0 : i32, i32
  }
  func.func @transform_9(%arg0: i32) -> (i32, i32) {
    %c0_i32 = arith.constant 0 : i32
    %c0_i32_0 = arith.constant 0 : i32
    %c0_i32_1 = arith.constant 0 : i32
    return %c0_i32, %c0_i32_0 : i32, i32
  }
  func.func @transform_10(%arg0: i32) -> (i32, i32) {
    %c0_i32 = arith.constant 0 : i32
    %c0_i32_0 = arith.constant 0 : i32
    %c0_i32_1 = arith.constant 0 : i32
    return %c0_i32, %c0_i32_0 : i32, i32
  }
  func.func @transform_11(%arg0: i32) -> (i32, i32) {
    %c0_i32 = arith.constant 0 : i32
    %c0_i32_0 = arith.constant 0 : i32
    return %arg0, %c0_i32 : i32, i32
  }
}

</mosaic_0001>

<bundles_post_ra>
// kernel: tpu_custom_call.1
= control target key start
LH: loop header
LB: loop body
LE: loop exit
PB: predicated region body
PF: predicated region fallthrough
CT: control target
= control target key end

     0   :  { %16 = vsyncpa [#allocation4], 0  ;;  %s4908_s0 = inlined_call_operand.vmem [shape: f32[128,128], index: 0, kind: input, shape index: {}]   ;;  %s4909_s1 = inlined_call_operand.vmem [shape: bf16[128,128], index: 1, kind: input, shape index: {}]   ;;  %s4910_s2 = inlined_call_operand.vmem [shape: f32[1,128], index: 2, kind: input, shape index: {}]   ;;  %s4911_s3 = inlined_call_operand.hbm [shape: bf16[1152,128], index: 3, kind: input, shape index: {}]   ;;  %s4912_s4 = inlined_call_operand.vmem [shape: f32[1,128], index: 4, kind: input, shape index: {}]   ;;  %s4913_s5 = inlined_call_operand.vmem [shape: bf16[128,128], index: 5, kind: input, shape index: {}]   ;;  %s4914_s6 = inlined_call_operand.vmem [shape: f32[1,128], index: 6, kind: input, shape index: {}]   ;;  %s4915_s7 = inlined_call_operand.vmem [shape: f32[128,1], index: 7, kind: input, shape index: {}]   ;;  %s4916_s8 = inlined_call_operand.vmem [shape: f32[128,1], index: 8, kind: input, shape index: {}]   ;;  %s4917_s9 = inlined_call_operand.vmem [shape: f32[128,1], index: 9, kind: input, shape index: {}]   ;;  %s4918_s10 = inlined_call_operand.vmem [shape: f32[128,1], index: 10, kind: input, shape index: {}]   ;;  %s4919_s11 = inlined_call_operand.hbm [shape: f32[128,128], index: 11, kind: output, shape index: {}]  }
   0x1   :  { %17 = vsyncpa [#allocation5], 0  ;;  %s28_s19 = sshll.u32 %s4911_s3, 4  ;;  %s3662_s20 = smov [#allocation3]   ;;  %s29_s19 = int_to_ptr.hbm [resolvable:$true] %s28_s19 }
   0x2   :  { %s30_s21 = sshll.u32 %s3662_s20, 4  ;;  %s3663_s22 = smov 64   ;;  %s31_s21 = int_to_ptr.vmem [resolvable:$true] %s30_s21 }
   0x3   :  { %s3664_s23 = smov 4  }
   0x4   :  { %36 = dma.hbm_to_vmem [thread:$0]  %s29_s19, 9216, %s31_s21, [#allocation4], %s3663_s22, %s3663_s22, %s3664_s23  }
   0x5   :  { %3658 = dma.done.wait [#allocation4], 9216  }
   0x6   :  { %3659 = vsyncadd [#allocation4], 4294958080  ;;  %v3665_v0 = vmov 0   ;;  %v248_v1 = vld [vmem:[%s4917_s9 + $0x20] sm:$0xff]  ;;  %v217_v2 = vld [vmem:[%s4915_s7 + $0x28] sm:$0xff]  ;;  %s3666_s22 = smov [#allocation6]  }
   0x7   :  { %3590 = vset.pattern.permute.xlu2 %v3665_v0  ;;  %3589 = vset.pattern.permute.xlu1 %v3665_v0  ;;  %v215_v3 = vld [vmem:[%s4915_s7 + $0x18] sm:$0xff]  ;;  %v3403_v5 = vld [vmem:[%s4909_s1 + $0x30] sm:$0xff]  ;;  %v249_v6 = vld [vmem:[%s4917_s9 + $0x28] sm:$0xff]  ;;  %s3667_s25 = smov 128  }
   0x8   :  { %3588 = vset.pattern.permute.xlu0 %v3665_v0  ;;  %558 = vperm.xlu1 %3589, %v248_v1   ;;  %v3404_v4 = vld [vmem:[%s4909_s1 + $0x38] sm:$0xff]  ;;  %v218_v7 = vld [vmem:[%s4915_s7 + $0x30] sm:$0xff]  ;;  %v216_v8 = vld [vmem:[%s4915_s7 + $0x20] sm:$0xff] }
   0x9   :  { %338 = vperm.xlu2 %3590, %v217_v2   ;;  %328 = vperm.xlu0 %3588, %v215_v3   ;;  %v3402_v9 = vld [vmem:[%s4909_s1 + $0x28] sm:$0xff]  ;;  %v3401_v10 = vld [vmem:[%s4909_s1 + $0x20] sm:$0xff]  ;;  %v251_v11 = vld [vmem:[%s4917_s9 + $0x38] sm:$0xff] }
   0xa   :  { %147 = vmatpush.bf16.msra.mxu0 %v3404_v4  ;;  %3557 = vmatpush.bf16.msra.mxu3 %v3404_v4  ;;  %v212_v12 = vld [vmem:[%s4915_s7] sm:$0xff]  ;;  %v250_v13 = vld [vmem:[%s4917_s9 + $0x30] sm:$0xff]  ;;  %v3400_v14 = vld [vmem:[%s4909_s1 + $0x18] sm:$0xff] }
   0xb   :  { %v3399_v15 = vld [vmem:[%s4909_s1 + $0x10] sm:$0xff]  ;;  %v219_v16 = vld [vmem:[%s4915_s7 + $0x38] sm:$0xff]  ;;  %v220_v17 = vld [vmem:[%s4915_s7 + $0x40] sm:$0xff] }
   0xc   :  { %v227_v18 = vld [vmem:[%s4915_s7 + $0x78] sm:$0xff]  ;;  %v3398_v19 = vld [vmem:[%s4909_s1 + $0x8] sm:$0xff]  ;;  %v3397_v20 = vld [vmem:[%s4909_s1] sm:$0xff] }
   0xd   :  { %v55_v21 = vld [vmem:[%s4908_s0] sm:$0xff]  ;;  %v56_v22 = vld [vmem:[%s4908_s0 + $0x8] sm:$0xff]  ;;  %v214_v31 = vld [vmem:[%s4915_s7 + $0x10] sm:$0xff] }
   0xe   :  { %148 = vmatpush.bf16.msra.mxu0 %v3403_v5  ;;  %3558 = vmatpush.bf16.msra.mxu3 %v3403_v5  ;;  %v59_v23 = vld [vmem:[%s4908_s0 + $0x20] sm:$0xff]  ;;  %v60_v24 = vld [vmem:[%s4908_s0 + $0x28] sm:$0xff]  ;;  %v71_v27 = vpack.c.bf16 %v56_v22, %v55_v21  ;;  %v57_v33 = vld [vmem:[%s4908_s0 + $0x10] sm:$0xff] }
   0xf   :  { %v245_v25 = vld [vmem:[%s4917_s9 + $0x8] sm:$0xff]  ;;  %v252_v26 = vld [vmem:[%s4917_s9 + $0x40] sm:$0xff]  ;;  %v73_v29 = vpack.c.bf16 %v60_v24, %v59_v23  ;;  %v58_v34 = vld [vmem:[%s4908_s0 + $0x18] sm:$0xff] }
  0x10   :  { %563 = vperm.xlu1 %3589, %v249_v6   ;;  %v244_v28 = vld [vmem:[%s4917_s9] sm:$0xff]  ;;  %v213_v30 = vld [vmem:[%s4915_s7 + $0x8] sm:$0xff]  ;;  %v61_v35 = vld [vmem:[%s4908_s0 + $0x30] sm:$0xff]  ;;  %v72_v39 = vpack.c.bf16 %v58_v34, %v57_v33 }
  0x11   :  { %343 = vperm.xlu2 %3590, %v218_v7   ;;  %333 = vperm.xlu0 %3588, %v216_v8   ;;  %v253_v32 = vld [vmem:[%s4917_s9 + $0x48] sm:$0xff]  ;;  %v62_v36 = vld [vmem:[%s4908_s0 + $0x38] sm:$0xff]  ;;  %v222_v37 = vld [vmem:[%s4915_s7 + $0x50] sm:$0xff] }
  0x12   :  { %149 = vmatpush.bf16.msra.mxu0 %v3402_v9  ;;  %3559 = vmatpush.bf16.msra.mxu3 %v3402_v9  ;;  %v246_v38 = vld [vmem:[%s4917_s9 + $0x10] sm:$0xff]  ;;  %v221_v40 = vld [vmem:[%s4915_s7 + $0x48] sm:$0xff]  ;;  %v74_v41 = vpack.c.bf16 %v62_v36, %v61_v35  ;;  %v255_v43 = vld [vmem:[%s4917_s9 + $0x58] sm:$0xff] }
  0x13   :  { %v254_v42 = vld [vmem:[%s4917_s9 + $0x50] sm:$0xff]  ;;  %v247_v44 = vld [vmem:[%s4917_s9 + $0x18] sm:$0xff]  ;;  %v63_v45 = vld [vmem:[%s4908_s0 + $0x40] sm:$0xff] }
  0x14   :  { %v64_v46 = vld [vmem:[%s4908_s0 + $0x48] sm:$0xff]  ;;  %v224_v47 = vld [vmem:[%s4915_s7 + $0x60] sm:$0xff]  ;;  %v223_v49 = vld [vmem:[%s4915_s7 + $0x58] sm:$0xff] }
  0x15   :  { %v256_v48 = vld [vmem:[%s4917_s9 + $0x60] sm:$0xff]  ;;  %v75_v50 = vpack.c.bf16 %v64_v46, %v63_v45  ;;  %v225_v51 = vld [vmem:[%s4915_s7 + $0x68] sm:$0xff]  ;;  %v226_v52 = vld [vmem:[%s4915_s7 + $0x70] sm:$0xff]  ;;  %s2742_s7 = sshll.u32 %s3666_s22, 4  ;;  %s2743_s7 = int_to_ptr.vmem [resolvable:$true] %s2742_s7 }
  0x16   :  { %150 = vmatpush.bf16.msra.mxu0 %v3401_v10  ;;  %3560 = vmatpush.bf16.msra.mxu3 %v3401_v10  ;;  %v257_v53 = vld [vmem:[%s4917_s9 + $0x68] sm:$0xff]  ;;  %v65_v54 = vld [vmem:[%s4908_s0 + $0x50] sm:$0xff]  ;;  %v66_v55 = vld [vmem:[%s4908_s0 + $0x58] sm:$0xff] }
  0x17   :  { %v259_v56 = vld [vmem:[%s4917_s9 + $0x78] sm:$0xff]  ;;  %v228_v57 = vld [vmem:[%s4916_s8] sm:$0xff]  ;;  %v258_v58 = vld [vmem:[%s4917_s9 + $0x70] sm:$0xff]  ;;  %v76_v59 = vpack.c.bf16 %v66_v55, %v65_v54 }
  0x18   :  { %573 = vperm.xlu1 %3589, %v251_v11   ;;  %v229_v60 = vld [vmem:[%s4916_s8 + $0x8] sm:$0xff]  ;;  %v230_v61 = vld [vmem:[%s4916_s8 + $0x10] sm:$0xff]  ;;  %v243_v62 = vld [vmem:[%s4916_s8 + $0x78] sm:$0xff] }
  0x19   :  { %313 = vperm.xlu2 %3590, %v212_v12   ;;  %568 = vperm.xlu0 %3588, %v250_v13   ;;  %v67_v0 = vld [vmem:[%s4908_s0 + $0x60] sm:$0xff]  ;;  %v68_v1 = vld [vmem:[%s4908_s0 + $0x68] sm:$0xff]  ;;  %v231_v4 = vld [vmem:[%s4916_s8 + $0x18] sm:$0xff] }
  0x1a   :  { %151 = vmatpush.bf16.msra.mxu0 %v3400_v14  ;;  %3561 = vmatpush.bf16.msra.mxu3 %v3400_v14  ;;  %v232_v2 = vld [vmem:[%s4916_s8 + $0x20] sm:$0xff]  ;;  %v233_v3 = vld [vmem:[%s4916_s8 + $0x28] sm:$0xff]  ;;  %v77_v5 = vpack.c.bf16 %v68_v1, %v67_v0  ;;  %v235_v7 = vld [vmem:[%s4916_s8 + $0x38] sm:$0xff] }
  0x1b   :  { %v236_v8 = vld [vmem:[%s4916_s8 + $0x40] sm:$0xff]  ;;  %v234_v9 = vld [vmem:[%s4916_s8 + $0x30] sm:$0xff]  ;;  %v70_v12 = vld [vmem:[%s4908_s0 + $0x78] sm:$0xff] }
  0x1c   :  { %v69_v11 = vld [vmem:[%s4908_s0 + $0x70] sm:$0xff]  ;;  %v239_v14 = vld [vmem:[%s4916_s8 + $0x58] sm:$0xff]  ;;  %v240_v22 = vld [vmem:[%s4916_s8 + $0x60] sm:$0xff] }
  0x1d   :  { %v238_v13 = vld [vmem:[%s4916_s8 + $0x50] sm:$0xff]  ;;  %v265_v33 = vld [vmem:[%s4918_s10 + $0x28] sm:$0xff]  ;;  %v263_v34 = vld [vmem:[%s4918_s10 + $0x18] sm:$0xff] }
  0x1e   :  { %152 = vmatpush.bf16.msra.mxu0 %v3399_v15  ;;  %3562 = vmatpush.bf16.msra.mxu3 %v3399_v15  ;;  %v237_v15 = vld [vmem:[%s4916_s8 + $0x48] sm:$0xff]  ;;  %v242_v21 = vld [vmem:[%s4916_s8 + $0x70] sm:$0xff]  ;;  %v3990_v35 = vld [vmem:[#allocation3 + $0x78] sm:$0xff] }
  0x1f   :  { %3573 = vmatpush.bf16.msra.mxu2 %v3990_v35  ;;  %v4015_v46 = vld [vmem:[#allocation3 + $0x68] sm:$0xff] }
  0x20   :  { %348 = vperm.xlu1 %3589, %v219_v16   ;;  %v78_v16 = vpack.c.bf16 %v70_v12, %v69_v11  ;;  %v4068_v11 = vld [vmem:[#allocation3 + $0x50] sm:$0xff] }
  0x21   :  { %353 = vperm.xlu2 %3590, %v220_v17   ;;  %388 = vperm.xlu0 %3588, %v227_v18  }
  0x22   :  { %153 = vmatpush.bf16.msra.mxu0 %v3398_v19  ;;  %3563 = vmatpush.bf16.msra.mxu3 %v3398_v19 }
  0x26   :  { %154 = vmatpush.bf16.msra.mxu0 %v3397_v20  ;;  %3564 = vmatpush.bf16.msra.mxu3 %v3397_v20  ;;  %v241_v20 = vld [vmem:[%s4916_s8 + $0x68] sm:$0xff]  ;;  %s2744_s8 = sshll.u32 %s4919_s11, 4  ;;  %s2745_s8 = int_to_ptr.hbm [resolvable:$true] %s2744_s8 }
  0x28   :  { %543 = vperm.xlu1 %3589, %v245_v25  }
  0x29   :  { %578 = vperm.xlu2 %3590, %v252_v26   ;;  %538 = vperm.xlu0 %3588, %v244_v28   ;;  %v261_v26 = vld [vmem:[%s4918_s10 + $0x8] sm:$0xff]  ;;  %v260_v28 = vld [vmem:[%s4918_s10] sm:$0xff] }
  0x2a   :  { %155 = vmatmul.bf16.vlgmr.msra.gmra.mxu0 %v71_v27  ;;  %165 = vmatmul.bf16.vlgmr.msra.gmra.mxu3 %v73_v29  ;;  %v262_v27 = vld [vmem:[%s4918_s10 + $0x10] sm:$0xff] }
  0x30   :  { %318 = vperm.xlu1 %3589, %v213_v30  }
  0x31   :  { %323 = vperm.xlu2 %3590, %v214_v31   ;;  %583 = vperm.xlu0 %3588, %v253_v32   ;;  %v264_v32 = vld [vmem:[%s4918_s10 + $0x20] sm:$0xff] }
  0x38   :  { %363 = vperm.xlu1 %3589, %v222_v37  }
  0x39   :  { %548 = vperm.xlu2 %3590, %v246_v38   ;;  %358 = vperm.xlu0 %3588, %v221_v40   ;;  %v268_v40 = vld [vmem:[%s4918_s10 + $0x40] sm:$0xff] }
  0x3a   :  { %160 = vmatmul.bf16.gmra.mxu0 %v72_v39  ;;  %170 = vmatmul.bf16.gmra.mxu3 %v74_v41  ;;  %v267_v39 = vld [vmem:[%s4918_s10 + $0x38] sm:$0xff]  ;;  %v266_v41 = vld [vmem:[%s4918_s10 + $0x30] sm:$0xff] }
  0x40   :  { %588 = vperm.xlu1 %3589, %v254_v42   ;;  %v4008_v42 = vld [vmem:[#allocation3 + $0x70] sm:$0xff] }
  0x41   :  { %593 = vperm.xlu2 %3590, %v255_v43   ;;  %553 = vperm.xlu0 %3588, %v247_v44   ;;  %v3484_v43 = vld [vmem:[#allocation3 + $0x38] sm:$0xff] }
  0x42   :  { %3574 = vmatpush.bf16.msra.mxu2 %v4008_v42  ;;  %3565 = vmatpush.bf16.msra.mxu1 %v3484_v43 }
  0x43   :  { %2108 = vmatpush.bf16.msrb.mxu0 %v3484_v43 }
  0x46   :  { %3575 = vmatpush.bf16.msra.mxu2 %v4015_v46 }
  0x48   :  { %373 = vperm.xlu1 %3589, %v224_v47  }
  0x49   :  { %598 = vperm.xlu2 %3590, %v256_v48   ;;  %368 = vperm.xlu0 %3588, %v223_v49   ;;  %v3483_v48 = vld [vmem:[#allocation3 + $0x30] sm:$0xff] }
  0x4a   :  { %175 = vmatmul.bf16.gmra.mxu3 %v75_v50  ;;  %v270_v49 = vld [vmem:[%s4918_s10 + $0x50] sm:$0xff]  ;;  %v271_v50 = vld [vmem:[%s4918_s10 + $0x58] sm:$0xff]  ;;  %3566 = vmatpush.bf16.msra.mxu1 %v3483_v48 }
  0x4b   :  { %2109 = vmatpush.bf16.msrb.mxu0 %v3483_v48 }
  0x50   :  { %378 = vperm.xlu1 %3589, %v225_v51   ;;  %v269_v51 = vld [vmem:[%s4918_s10 + $0x48] sm:$0xff] }
  0x51   :  { %383 = vperm.xlu2 %3590, %v226_v52   ;;  %603 = vperm.xlu0 %3588, %v257_v53   ;;  %v4029_v52 = vld [vmem:[#allocation3 + $0x60] sm:$0xff]  ;;  %v3482_v53 = vld [vmem:[#allocation3 + $0x28] sm:$0xff] }
  0x52   :  { %3576 = vmatpush.bf16.msra.mxu2 %v4029_v52  ;;  %3567 = vmatpush.bf16.msra.mxu1 %v3482_v53 }
  0x53   :  { %2110 = vmatpush.bf16.msrb.mxu0 %v3482_v53  ;;  %v4100_v53 = vld [vmem:[#allocation3 + $0x40] sm:$0xff] }
  0x58   :  { %613 = vperm.xlu1 %3589, %v259_v56  }
  0x59   :  { %442 = vperm.xlu2 %3590, %v228_v57   ;;  %608 = vperm.xlu0 %3588, %v258_v58   ;;  %v4038_v57 = vld [vmem:[#allocation3 + $0x58] sm:$0xff]  ;;  %v4043_v58 = vld [vmem:[%s4910_s2] ss:$0 sm:$0xff] }
  0x5a   :  { %180 = vmatmul.bf16.gmra.mxu3 %v76_v59  ;;  %v273_v59 = vld [vmem:[%s4918_s10 + $0x68] sm:$0xff]  ;;  %3577 = vmatpush.bf16.msra.mxu2 %v4038_v57 }
  0x5e   :  { %3578 = vmatpush.bf16.msra.mxu2 %v4068_v11 }
  0x60   :  { %447 = vperm.xlu1 %3589, %v229_v60   ;;  %v274_v60 = vld [vmem:[%s4918_s10 + $0x70] sm:$0xff] }
  0x61   :  { %452 = vperm.xlu2 %3590, %v230_v61   ;;  %517 = vperm.xlu0 %3588, %v243_v62   ;;  %v272_v62 = vld [vmem:[%s4918_s10 + $0x60] sm:$0xff] }
  0x63   :  { %v3900_v63 = vpop.permute.xlu2 %338 }
  0x68   :  { %462 = vperm.xlu1 %3589, %v232_v2   ;;  %v3481_v2 = vld [vmem:[#allocation3 + $0x20] sm:$0xff] }
  0x69   :  { %467 = vperm.xlu2 %3590, %v233_v3   ;;  %457 = vperm.xlu0 %3588, %v231_v4  }
  0x6a   :  { %185 = vmatmul.bf16.gmra.mxu3 %v77_v5  ;;  %3568 = vmatpush.bf16.msra.mxu1 %v3481_v2 }
  0x6b   :  { %v3917_v6 = vpop.permute.xlu2 %343  ;;  %2111 = vmatpush.bf16.msrb.mxu0 %v3481_v2 }
  0x70   :  { %477 = vperm.xlu1 %3589, %v235_v7  }
  0x71   :  { %482 = vperm.xlu2 %3590, %v236_v8   ;;  %472 = vperm.xlu0 %3588, %v234_v9   ;;  %v292_v9 = vlaneseq }
  0x73   :  { %v3928_v10 = vpop.permute.xlu2 %313 }
  0x78   :  { %492 = vperm.xlu1 %3589, %v238_v13  }
  0x79   :  { %497 = vperm.xlu2 %3590, %v239_v14   ;;  %487 = vperm.xlu0 %3588, %v237_v15   ;;  %v3480_v14 = vld [vmem:[#allocation3 + $0x18] sm:$0xff] }
  0x7a   :  { %190 = vmatmul.bf16.gmra.mxu3 %v78_v16  ;;  %v3945_v17 = vpop.permute.xlu1 %558  ;;  %3569 = vmatpush.bf16.msra.mxu1 %v3480_v14 }
  0x7b   :  { %v3947_v18 = vpop.permute.xlu2 %353  ;;  %v3949_v19 = vpop.permute.xlu0 %328  ;;  %2112 = vmatpush.bf16.msrb.mxu0 %v3480_v14 }
  0x80   :  { %507 = vperm.xlu1 %3589, %v241_v20   ;;  %v275_v20 = vld [vmem:[%s4918_s10 + $0x78] sm:$0xff]  ;;  %s3668_s10 = smov 8  }
  0x81   :  { %512 = vperm.xlu2 %3590, %v242_v21   ;;  %502 = vperm.xlu0 %3588, %v240_v22  }
  0x82   :  { %v3960_v23 = vpop.permute.xlu1 %563 }
  0x83   :  { %v3962_v24 = vpop.permute.xlu2 %578  ;;  %v3964_v25 = vpop.permute.xlu0 %333 }
  0x88   :  { %863 = vperm.xlu1 %3589, %v261_v26   ;;  %v4078_v26 = vshrl.u32 %v292_v9, 7 }
  0x89   :  { %868 = vperm.xlu2 %3590, %v262_v27   ;;  %858 = vperm.xlu0 %3588, %v260_v28   ;;  %v4080_v27 = vld [vmem:[#allocation3 + $0x48] sm:$0xff] }
  0x8a   :  { %v3975_v29 = vpop.permute.xlu1 %573  ;;  %3579 = vmatpush.bf16.msra.mxu2 %v4080_v27  ;;  %vm423_vm0 = vcmp.lt.s32.totalorder %v4078_v26, 7  ;;  %vm294_vm1 = vcmp.lt.s32.totalorder %v4078_v26, 1 }
  0x8b   :  { %v3977_v30 = vpop.permute.xlu2 %323  ;;  %v3979_v31 = vpop.permute.xlu0 %568 }
  0x8e   :  { %3580 = vmatpush.bf16.msra.mxu2 %v4100_v53 }
  0x90   :  { %878 = vperm.xlu1 %3589, %v264_v32  }
  0x91   :  { %883 = vperm.xlu2 %3590, %v265_v33   ;;  %873 = vperm.xlu0 %3588, %v263_v34   ;;  %v3479_v33 = vld [vmem:[#allocation3 + $0x10] sm:$0xff] }
  0x92   :  { %v3992_v36 = vpop.permute.xlu1 %348  ;;  %3570 = vmatpush.bf16.msra.mxu1 %v3479_v33  ;;  %2113 = vmatpush.bf16.msrb.mxu0 %v3479_v33 }
  0x93   :  { %v3994_v37 = vpop.permute.xlu2 %548  ;;  %v3996_v38 = vpop.permute.xlu0 %388 }
  0x94   :  { %4933 = vst [vmem:[#allocation9_spill] sm:$0xff] %v3996_v38 }
  0x98   :  { %893 = vperm.xlu1 %3589, %v267_v39  }
  0x99   :  { %898 = vperm.xlu2 %3590, %v268_v40   ;;  %888 = vperm.xlu0 %3588, %v266_v41  }
  0x9a   :  { %v4011_v44 = vpop.permute.xlu1 %543 }
  0x9b   :  { %v4013_v45 = vpop.permute.xlu2 %593  ;;  %v4017_v47 = vpop.permute.xlu0 %538 }
  0xa0   :  { %908 = vperm.xlu1 %3589, %v270_v49  }
  0xa1   :  { %913 = vperm.xlu2 %3590, %v271_v50   ;;  %903 = vperm.xlu0 %3588, %v269_v51  }
  0xa2   :  { %v4031_v54 = vpop.permute.xlu1 %318 }
  0xa3   :  { %v4033_v55 = vpop.permute.xlu2 %598  ;;  %v4036_v56 = vpop.permute.xlu0 %583 }
  0xa4   :  { %4934 = vst [vmem:[#allocation10_spill] sm:$0xff] %v4036_v56 }
  0xa7   :  { %v156_v61 = vpop.f32.mrf.mxu0 }
  0xa8   :  { %v157_v0 = vadd.f32 %v4043_v58, %v156_v61  ;;  %923 = vperm.xlu1 %3589, %v273_v59  }
  0xa9   :  { %928 = vperm.xlu2 %3590, %v274_v60   ;;  %918 = vperm.xlu0 %3588, %v272_v62   ;;  %v3478_v62 = vld [vmem:[#allocation3 + $0x8] sm:$0xff] }
  0xaa   :  { %v4056_v1 = vmax.f32 %v157_v0, 0.0  ;;  %v4058_v3 = vpop.permute.xlu1 %363  ;;  %3571 = vmatpush.bf16.msra.mxu1 %v3478_v62  ;;  %2114 = vmatpush.bf16.msrb.mxu0 %v3478_v62 }
  0xab   :  { %v4060_v4 = vpop.permute.xlu2 %383  ;;  %v4066_v8 = vpop.permute.xlu0 %358 }
  0xac   :  { %4935 = vst [vmem:[#allocation11_spill] sm:$0xff] %v4060_v4  ;;  %v665_v5 = vmul.f32 %v4011_v44, %v4056_v1  ;;  %v792_v7 = vpack.c.bf16 %v4056_v1, %v4056_v1  ;;  %v4920_v32 = vrot.slane %v4056_v1, 1 }
  0xad   :  { %v166_v13 = vpop.f32.mrf.mxu3 }
  0xae   :  { %v681_v12 = vpack.c.bf16 %v665_v5, %v665_v5  ;;  %808 = vst [vmem:[#allocation2 + $0x10] sm:$0xf] %v792_v7  ;;  %v167_v15 = vadd.f32 %v4043_v58, %v166_v13 }
  0xaf   :  { %v158_v16 = vpop.f32.mrf.mxu0 }
  0xb0   :  { %697 = vst [vmem:[#allocation2 + $0x28] sm:$0xf] %v681_v12  ;;  %v159_v21 = vadd.f32 %v4043_v58, %v158_v16  ;;  %v4076_v22 = vmax.f32 %v167_v15, 0.0  ;;  %v3477_v16 = vld [vmem:[#allocation3] sm:$0xff] }
  0xb1   :  { %933 = vperm.xlu0 %3588, %v275_v20   ;;  %3572 = vmatpush.bf16.msra.mxu1 %v3477_v16 }
  0xb2   :  { %v4082_v28 = vmax.f32 %v159_v21, 0.0  ;;  %v669_v34 = vmul.f32 %v3960_v23, %v4076_v22  ;;  %v796_v39 = vpack.c.bf16 %v4076_v22, %v4076_v22  ;;  %v4089_v40 = vpop.permute.xlu1 %588  ;;  %v280_v14 = vrot.slane %v4076_v22, 7  ;;  %2115 = vmatpush.bf16.msrb.mxu0 %v3477_v16 }
  0xb3   :  { %v443_v41 = vpop.permute.xlu2 %442  ;;  %v4096_v49 = vpop.permute.xlu0 %553 }
  0xb4   :  { %v666_v43 = vmul.f32 %v3994_v37, %v4082_v28  ;;  %v793_v48 = vpack.c.bf16 %v4082_v28, %v4082_v28  ;;  %v4921_v50 = vrot.slane %v4082_v28, 1  ;;  %v685_v51 = vpack.c.bf16 %v669_v34, %v669_v34  ;;  %812 = vst [vmem:[#allocation2 + $0xa0] sm:$0xf] %v796_v39 }
  0xb5   :  { %v168_v61 = vpop.f32.mrf.mxu3 }
  0xb6   :  { %v682_v59 = vpack.c.bf16 %v666_v43, %v666_v43  ;;  %809 = vst [vmem:[#allocation2 + $0x34] sm:$0xf] %v793_v48  ;;  %v438_v60 = vsel %vm423_vm0, %v4920_v32, %v4921_v50  ;;  %v169_v2 = vadd.f32 %v4043_v58, %v168_v61  ;;  %2157 = vmatpush.bf16.msra.mxu0 %v3990_v35 }
  0xb7   :  { %701 = vst [vmem:[#allocation2 + $0xb8] sm:$0xf] %v685_v51  ;;  %v4108_v0 = vmul.f32 %v443_v41, %v438_v60  ;;  %v161_v5 = vpop.f32.mrf.mxu0 }
  0xb8   :  { %698 = vst [vmem:[#allocation2 + $0x4c] sm:$0xf] %v682_v59  ;;  %v162_v7 = vadd.f32 %v4043_v58, %v161_v5  ;;  %v4117_v13 = vmax.f32 %v169_v2, 0.0 }
  0xb9   :  { %4936 = vst [vmem:[#allocation12_spill] sm:$0xff] %v4108_v0  ;;  %v713_v9 = vmul.f32 %v4011_v44, %v4108_v0  ;;  %v824_v12 = vpack.c.bf16 %v4108_v0, %v4108_v0 }
  0xba   :  { %v4121_v15 = vmax.f32 %v162_v7, 0.0  ;;  %v281_v21 = vrot.slane %v4117_v13, 7  ;;  %v670_v33 = vmul.f32 %v3979_v31, %v4117_v13  ;;  %v797_v34 = vpack.c.bf16 %v4117_v13, %v4117_v13  ;;  %v4128_v39 = vpop.permute.xlu1 %373  ;;  %2158 = vmatpush.bf16.msra.mxu0 %v4008_v42 }
  0xbb   :  { %v729_v20 = vpack.c.bf16 %v713_v9, %v713_v9  ;;  %840 = vst [vmem:[#allocation2 + $0x14] sm:$0xf] %v824_v12  ;;  %v4130_v41 = vpop.permute.xlu2 %452  ;;  %v4134_v48 = vpop.permute.xlu0 %368 }
  0xbc   :  { %v667_v43 = vmul.f32 %v4096_v49, %v4121_v15  ;;  %4937 = vst [vmem:[#allocation13_spill] sm:$0xff] %v4134_v48  ;;  %v305_v51 = vsel %vm294_vm1, %v280_v14, %v281_v21  ;;  %v686_v59 = vpack.c.bf16 %v670_v33, %v670_v33  ;;  %v794_v60 = vpack.c.bf16 %v4121_v15, %v4121_v15 }
  0xbd   :  { %745 = vst [vmem:[#allocation2 + $0x2c] sm:$0xf] %v729_v20  ;;  %v4142_v61 = vmul.f32 %v3900_v63, %v305_v51  ;;  %v171_v2 = vpop.f32.mrf.mxu3  ;;  %v278_v20 = vrot.slane %v4121_v15, 7 }
  0xbe   :  { %813 = vst [vmem:[#allocation2 + $0xc4] sm:$0xf] %v797_v34  ;;  %v683_v62 = vpack.c.bf16 %v667_v43, %v667_v43  ;;  %v172_v5 = vadd.f32 %v4043_v58, %v171_v2  ;;  %v4924_v34 = vrot.slane %v4117_v13, 1  ;;  %2159 = vmatpush.bf16.msra.mxu0 %v4015_v46 }
  0xbf   :  { %702 = vst [vmem:[#allocation2 + $0xdc] sm:$0xf] %v686_v59  ;;  %v163_v7 = vpop.f32.mrf.mxu0  ;;  %v622_v9 = vmul.f32 %v3979_v31, %v4142_v61  ;;  %v765_v12 = vpack.c.bf16 %v4142_v61, %v4142_v61 }
  0xc0   :  { %699 = vst [vmem:[#allocation2 + $0x70] sm:$0xf] %v683_v62  ;;  %v164_v16 = vadd.f32 %v4043_v58, %v163_v7  ;;  %v4150_v35 = vmax.f32 %v172_v5, 0.0 }
  0xc1   :  { %810 = vst [vmem:[#allocation2 + $0x58] sm:$0xf] %v794_v60  ;;  %v638_v63 = vpack.c.bf16 %v622_v9, %v622_v9 }
  0xc2   :  { %781 = vst [vmem:[#allocation2 + $0xc0] sm:$0xf] %v765_v12  ;;  %v4154_v33 = vmax.f32 %v164_v16, 0.0  ;;  %v282_v43 = vrot.slane %v4150_v35, 7  ;;  %v671_v51 = vmul.f32 %v3975_v29, %v4150_v35  ;;  %v798_v59 = vpack.c.bf16 %v4150_v35, %v4150_v35  ;;  %v4162_v60 = vpop.permute.xlu1 %378  ;;  %2160 = vmatpush.bf16.msra.mxu0 %v4029_v52 }
  0xc3   :  { %4938 = vst [vmem:[#allocation14_spill] sm:$0xff] %v4162_v60  ;;  %v468_v62 = vpop.permute.xlu2 %467  ;;  %v4923_v42 = vrot.slane %v4150_v35, 1  ;;  %v4170_v9 = vpop.permute.xlu0 %603 }
  0xc4   :  { %654 = vst [vmem:[#allocation2 + $0xd8] sm:$0xf] %v638_v63  ;;  %v279_v2 = vrot.slane %v4154_v33, 7  ;;  %v668_v5 = vmul.f32 %v3945_v17, %v4154_v33  ;;  %v795_v7 = vpack.c.bf16 %v4154_v33, %v4154_v33  ;;  %v304_v12 = vsel %vm294_vm1, %v281_v21, %v282_v43 }
  0xc5   :  { %v687_v16 = vpack.c.bf16 %v671_v51, %v671_v51  ;;  %814 = vst [vmem:[#allocation2 + $0xe8] sm:$0xf] %v798_v59  ;;  %v433_v63 = vsel %vm423_vm0, %v4924_v34, %v4923_v42  ;;  %v4182_v32 = vmul.f32 %v3917_v6, %v304_v12  ;;  %v173_v59 = vpop.f32.mrf.mxu3  ;;  %v277_v34 = vrot.slane %v4082_v28, 7 }
  0xc6   :  { %v306_v50 = vsel %vm294_vm1, %v279_v2, %v280_v14  ;;  %v307_v21 = vsel %vm294_vm1, %v278_v20, %v279_v2  ;;  %v684_v51 = vpack.c.bf16 %v668_v5, %v668_v5  ;;  %811 = vst [vmem:[#allocation2 + $0x7c] sm:$0xf] %v795_v7  ;;  %v4194_v46 = vmul.f32 %v468_v62, %v433_v63 }
  0xc7   :  { %703 = vst [vmem:[#allocation2 + $0x100] sm:$0xf] %v687_v16  ;;  %v4189_v0 = vmul.f32 %v3949_v19, %v307_v21  ;;  %v4192_v42 = vmul.f32 %v3964_v25, %v306_v50  ;;  %v174_v6 = vadd.f32 %v4043_v58, %v173_v59  ;;  %v623_v14 = vmul.f32 %v3975_v29, %v4182_v32 }
  0xc8   :  { %v766_v2 = vpack.c.bf16 %v4182_v32, %v4182_v32  ;;  %700 = vst [vmem:[#allocation2 + $0x94] sm:$0xf] %v684_v51  ;;  %v4925_v50 = vrot.slane %v4056_v1, 7  ;;  %v718_v7 = vmul.f32 %v3979_v31, %v4194_v46  ;;  %2161 = vmatpush.bf16.msra.mxu0 %v4038_v57  ;;  %v2865_v57 = vld [vmem:[#allocation2 + $0xb4] sm:$0xf0] }
  0xc9   :  { %v620_v5 = vmul.f32 %v3945_v17, %v4189_v0  ;;  %v621_v19 = vmul.f32 %v3960_v23, %v4192_v42  ;;  %v763_v25 = vpack.c.bf16 %v4189_v0, %v4189_v0  ;;  %v639_v62 = vpack.c.bf16 %v623_v14, %v623_v14 }
  0xca   :  { %782 = vst [vmem:[#allocation2 + $0xe4] sm:$0xf] %v766_v2  ;;  %v4211_v12 = vmax.f32 %v174_v6, 0.0  ;;  %v764_v21 = vpack.c.bf16 %v4192_v42, %v4192_v42  ;;  %v4215_v51 = vpop.permute.xlu1 %613  ;;  %v734_v52 = vpack.c.bf16 %v718_v7, %v718_v7 }
  0xcb   :  { %v636_v16 = vpack.c.bf16 %v620_v5, %v620_v5  ;;  %v637_v63 = vpack.c.bf16 %v621_v19, %v621_v19  ;;  %779 = vst [vmem:[#allocation2 + $0x78] sm:$0xf] %v763_v25  ;;  %v4217_v59 = vpop.permute.xlu2 %482  ;;  %v4223_v6 = vpop.permute.xlu0 %608  ;;  %v829_v5 = vpack.c.bf16 %v4194_v46, %v4194_v46  ;;  %v309_v19 = vsel %vm294_vm1, %v4925_v50, %v277_v34 }
  0xcc   :  { %655 = vst [vmem:[#allocation2 + $0xfc] sm:$0xf] %v639_v62  ;;  %v283_v14 = vrot.slane %v4211_v12, 7  ;;  %v672_v31 = vmul.f32 %v3962_v24, %v4211_v12  ;;  %v308_v25 = vsel %vm294_vm1, %v277_v34, %v278_v20  ;;  %2162 = vmatpush.bf16.msra.mxu0 %v4068_v11 }
  0xcd   :  { %652 = vst [vmem:[#allocation2 + $0x90] sm:$0xf] %v636_v16  ;;  %v176_v2 = vpop.f32.mrf.mxu3  ;;  %v4238_v16 = vmul.f32 %v4031_v54, %v309_v19  ;;  %v4241_v4 = vmul.f32 %v3977_v30, %v308_v25  ;;  %v4940_v54 = vrot.slane %v4082_v28, 1 }
  0xce   :  { %653 = vst [vmem:[#allocation2 + $0xb4] sm:$0xf] %v637_v63  ;;  %v303_v62 = vsel %vm294_vm1, %v282_v43, %v283_v14  ;;  %v688_v7 = vpack.c.bf16 %v672_v31, %v672_v31  ;;  %v177_v20 = vadd.f32 %v4043_v58, %v176_v2  ;;  %v799_v43 = vpack.c.bf16 %v4211_v12, %v4211_v12 }
  0xcf   :  { %780 = vst [vmem:[#allocation2 + $0x9c] sm:$0xf] %v764_v21  ;;  %v4244_v50 = vmul.f32 %v3992_v36, %v303_v62  ;;  %v3423_v34 = vld [vmem:[#allocation2 + $0x94] sm:$0xf]  ;;  %v4939_v31 = vrot.slane %v4121_v15, 1  ;;  %v4257_v36 = vmul.f32 %v4096_v49, %v4241_v4  ;;  %v618_v19 = vmul.f32 %v3994_v37, %v4238_v16 }
  0xd0   :  { %750 = vst [vmem:[#allocation2 + $0xe0] sm:$0xf] %v734_v52  ;;  %v2868_v63 = vor.u32 %v3423_v34, %v2865_v57  ;;  %v4263_v2 = vmax.f32 %v177_v20, 0.0  ;;  %2163 = vmatpush.bf16.msra.mxu0 %v4080_v27  ;;  %v4926_v27 = vrot.slane %v4154_v33, 1 }
  0xd1   :  { %v437_v30 = vsel %vm423_vm0, %v4940_v54, %v4939_v31  ;;  %845 = vst [vmem:[#allocation2 + $0xc8] sm:$0xf] %v829_v5  ;;  %v624_v21 = vmul.f32 %v3962_v24, %v4244_v50  ;;  %v767_v52 = vpack.c.bf16 %v4244_v50, %v4244_v50 }
  0xd2   :  { %704 = vst [vmem:[#allocation2 + $0x124] sm:$0xf] %v688_v7  ;;  %2175 = vmatmul.bf16.vlgmr.msra.gmra.mxu2 %v2868_v63  ;;  %v673_v5 = vmul.f32 %v4036_v56, %v4263_v2  ;;  %v800_v62 = vpack.c.bf16 %v4263_v2, %v4263_v2  ;;  %v448_v34 = vpop.permute.xlu1 %447  ;;  %v284_v11 = vrot.slane %v4263_v2, 7 }
  0xd3   :  { %v640_v25 = vpack.c.bf16 %v624_v21, %v624_v21  ;;  %783 = vst [vmem:[#allocation2 + $0x108] sm:$0xf] %v767_v52  ;;  %v4272_v57 = vpop.permute.xlu2 %497  ;;  %v4274_v20 = vpop.permute.xlu0 %517  ;;  %v4276_v31 = vmul.f32 %v448_v34, %v437_v30  ;;  %v634_v21 = vpack.c.bf16 %v618_v19, %v618_v19  ;;  %v411_v34 = vrot.slane %v4076_v22, 1 }
  0xd4   :  { %4941 = vst [vmem:[#allocation15_spill] sm:$0xff] %v4272_v57  ;;  %v2863_v54 = vld [vmem:[#allocation2 + $0x90] sm:$0xf]  ;;  %v689_v7 = vpack.c.bf16 %v673_v5, %v673_v5  ;;  %v302_v30 = vsel %vm294_vm1, %v283_v14, %v284_v11  ;;  %2164 = vmatpush.bf16.msra.mxu0 %v4100_v53  ;;  %v2901_v57 = vld [vmem:[#allocation2 + $0xfc] sm:$0xf0] }
  0xd5   :  { %815 = vst [vmem:[#allocation2 + $0x10c] sm:$0xf] %v799_v43  ;;  %v3427_v63 = vld [vmem:[#allocation2 + $0xb0] sm:$0xf0]  ;;  %v714_v52 = vmul.f32 %v3994_v37, %v4276_v31  ;;  %v825_v43 = vpack.c.bf16 %v4276_v31, %v4276_v31  ;;  %v178_v38 = vpop.f32.mrf.mxu3  ;;  %v4288_v5 = vmul.f32 %v3947_v18, %v302_v30  ;;  %v761_v37 = vpack.c.bf16 %v4238_v16, %v4238_v16 }
  0xd6   :  { %4942 = vst [vmem:[#allocation16_spill] sm:$0xff] %v4274_v20  ;;  %v2864_v20 = vor.u32 %v3427_v63, %v2863_v54  ;;  %v435_v53 = vsel %vm423_vm0, %v4926_v27, %v411_v34 }
  0xd7   :  { %656 = vst [vmem:[#allocation2 + $0x120] sm:$0xf] %v640_v25  ;;  %v179_v25 = vadd.f32 %v4043_v58, %v178_v38  ;;  %v730_v19 = vpack.c.bf16 %v714_v52, %v714_v52  ;;  %v625_v14 = vmul.f32 %v4036_v56, %v4288_v5  ;;  %v768_v38 = vpack.c.bf16 %v4288_v5, %v4288_v5 }
  0xd8   :  { %816 = vst [vmem:[#allocation2 + $0x130] sm:$0xf] %v800_v62  ;;  %2126 = vmatmul.bf16.vlgmr.msra.gmra.mxu1 %v2864_v20 }
  0xd9   :  { %705 = vst [vmem:[#allocation2 + $0x148] sm:$0xf] %v689_v7  ;;  %v4293_v62 = vmax.f32 %v179_v25, 0.0  ;;  %v4944_v7 = vrot.slane %v4117_v13, 1  ;;  %v641_v25 = vpack.c.bf16 %v625_v14, %v625_v14 }
  0xda   :  { %4943 = vst [vmem:[#allocation17_spill] sm:$0xff] %v4288_v5  ;;  %v463_v54 = vpop.permute.xlu1 %462 }
  0xdb   :  { %841 = vst [vmem:[#allocation2 + $0x38] sm:$0xf] %v825_v43  ;;  %v674_v18 = vmul.f32 %v4089_v40, %v4293_v62  ;;  %v801_v20 = vpack.c.bf16 %v4293_v62, %v4293_v62  ;;  %v434_v63 = vsel %vm423_vm0, %v411_v34, %v4944_v7  ;;  %v4309_v52 = vpop.permute.xlu2 %512  ;;  %v4927_v43 = vrot.slane %v4293_v62, 7 }
  0xdc   :  { %650 = vst [vmem:[#allocation2 + $0x48] sm:$0xf] %v634_v21  ;;  %v458_v21 = vpop.permute.xlu0 %457  ;;  %v4316_v30 = vmul.f32 %v463_v54, %v434_v63 }
  0xdd   :  { %746 = vst [vmem:[#allocation2 + $0x50] sm:$0xf] %v730_v19  ;;  %v690_v19 = vpack.c.bf16 %v674_v18, %v674_v18  ;;  %v523_v60 = vmul.f32 %v458_v21, %v435_v53  ;;  %v301_v7 = vsel %vm294_vm1, %v284_v11, %v4927_v43  ;;  %v181_v34 = vpop.f32.mrf.mxu3  ;;  %v4928_v11 = vrot.slane %v4263_v2, 1  ;;  %v2899_v43 = vld [vmem:[#allocation2 + $0xd8] sm:$0xf] }
  0xde   :  { %4945 = vst [vmem:[#allocation18_spill] sm:$0xff] %v4309_v52  ;;  %v828_v52 = vpack.c.bf16 %v4316_v30, %v4316_v30  ;;  %v4327_v54 = vmul.f32 %v4066_v8, %v301_v7  ;;  %v182_v18 = vadd.f32 %v4043_v58, %v181_v34  ;;  %v414_v21 = vrot.slane %v4211_v12, 1  ;;  %v3500_v8 = vld [vmem:[#allocation3 + $0xb8] sm:$0xff] }
  0xdf   :  { %784 = vst [vmem:[#allocation2 + $0x12c] sm:$0xf] %v768_v38  ;;  %v717_v38 = vmul.f32 %v3960_v23, %v4316_v30  ;;  %v827_v14 = vpack.c.bf16 %v523_v60, %v523_v60  ;;  %2206 = vmatpush.bf16.msrb.mxu3 %v3500_v8 }
  0xe0   :  { %777 = vst [vmem:[#allocation2 + $0x30] sm:$0xf] %v761_v37  ;;  %v716_v37 = vmul.f32 %v3945_v17, %v523_v60  ;;  %v626_v53 = vmul.f32 %v4089_v40, %v4327_v54  ;;  %v431_v34 = vsel %vm423_vm0, %v414_v21, %v4928_v11 }
  0xe1   :  { %817 = vst [vmem:[#allocation2 + $0x154] sm:$0xf] %v801_v20  ;;  %v3432_v20 = vld [vmem:[#allocation2 + $0xdc] sm:$0xf]  ;;  %v733_v63 = vpack.c.bf16 %v717_v38, %v717_v38 }
  0xe2   :  { %657 = vst [vmem:[#allocation2 + $0x144] sm:$0xf] %v641_v25  ;;  %v2904_v23 = vor.u32 %v3432_v20, %v2901_v57  ;;  %v732_v7 = vpack.c.bf16 %v716_v37, %v716_v37  ;;  %v4335_v25 = vmax.f32 %v182_v18, 0.0  ;;  %v642_v17 = vpack.c.bf16 %v626_v53, %v626_v53  ;;  %v478_v38 = vpop.permute.xlu1 %477 }
  0xe3   :  { %706 = vst [vmem:[#allocation2 + $0x16c] sm:$0xf] %v690_v19  ;;  %v769_v19 = vpack.c.bf16 %v4327_v54, %v4327_v54  ;;  %v869_v37 = vpop.permute.xlu2 %868  ;;  %v4946_v20 = vrot.slane %v4150_v35, 1 }
  0xe4   :  { %844 = vst [vmem:[#allocation2 + $0xa4] sm:$0xf] %v828_v52  ;;  %2180 = vmatmul.bf16.gmra.mxu2 %v2904_v23  ;;  %v675_v57 = vmul.f32 %v4013_v45, %v4335_v25  ;;  %v802_v52 = vpack.c.bf16 %v4335_v25, %v4335_v25  ;;  %v473_v18 = vpop.permute.xlu0 %472  ;;  %v4351_v23 = vmul.f32 %v478_v38, %v431_v34  ;;  %v4932_v38 = vrot.slane %v4335_v25, 7 }
  0xe5   :  { %843 = vst [vmem:[#allocation2 + $0x80] sm:$0xf] %v827_v14  ;;  %v3436_v14 = vld [vmem:[#allocation2 + $0xf8] sm:$0xf0]  ;;  %v938_v53 = vmul.f32 %v869_v37, %v4189_v0  ;;  %v986_v27 = vmul.f32 %v869_v37, %v4154_v33  ;;  %v1034_v5 = vmul.f32 %v869_v37, %v523_v60  ;;  %v183_v56 = vpop.f32.mrf.mxu3 }
  0xe6   :  { %749 = vst [vmem:[#allocation2 + $0xbc] sm:$0xf] %v733_v63  ;;  %v432_v63 = vsel %vm423_vm0, %v4946_v20, %v414_v21  ;;  %v691_v8 = vpack.c.bf16 %v675_v57, %v675_v57  ;;  %v720_v11 = vmul.f32 %v3962_v24, %v4351_v23  ;;  %v831_v48 = vpack.c.bf16 %v4351_v23, %v4351_v23 }
  0xe7   :  { %748 = vst [vmem:[#allocation2 + $0x98] sm:$0xf] %v732_v7  ;;  %v526_v7 = vmul.f32 %v473_v18, %v432_v63  ;;  %v2900_v21 = vor.u32 %v3436_v14, %v2899_v43  ;;  %v184_v57 = vadd.f32 %v4043_v58, %v183_v56  ;;  %v954_v34 = vpack.c.bf16 %v938_v53, %v938_v53 }
  0xe8   :  { %658 = vst [vmem:[#allocation2 + $0x168] sm:$0xf] %v642_v17  ;;  %v417_v24 = vrot.slane %v4335_v25, 1  ;;  %v1002_v60 = vpack.c.bf16 %v986_v27, %v986_v27  ;;  %v1050_v43 = vpack.c.bf16 %v1034_v5, %v1034_v5  ;;  %v4947_v14 = vrot.slane %v4293_v62, 7 }
  0xe9   :  { %818 = vst [vmem:[#allocation2 + $0x178] sm:$0xf] %v802_v52  ;;  %v719_v0 = vmul.f32 %v3975_v29, %v526_v7  ;;  %v830_v17 = vpack.c.bf16 %v526_v7, %v526_v7  ;;  %v736_v52 = vpack.c.bf16 %v720_v11, %v720_v11  ;;  %2131 = vmatmul.bf16.gmra.mxu1 %v2900_v21  ;;  %v4363_v37 = vmax.f32 %v184_v57, 0.0 }
  0xea   :  { %785 = vst [vmem:[#allocation2 + $0x150] sm:$0xf] %v769_v19  ;;  %v416_v19 = vrot.slane %v4293_v62, 1  ;;  %v493_v56 = vpop.permute.xlu1 %492  ;;  %v300_v27 = vsel %vm294_vm1, %v4947_v14, %v4932_v38 }
  0xeb   :  { %707 = vst [vmem:[#allocation2 + $0x190] sm:$0xf] %v691_v8  ;;  %v735_v18 = vpack.c.bf16 %v719_v0, %v719_v0  ;;  %v676_v29 = vmul.f32 %v4033_v55, %v4363_v37  ;;  %v884_v11 = vpop.permute.xlu2 %883  ;;  %v803_v5 = vpack.c.bf16 %v4363_v37, %v4363_v37 }
  0xec   :  { %847 = vst [vmem:[#allocation2 + $0x110] sm:$0xf] %v831_v48  ;;  %v4931_v48 = vrot.slane %v4363_v37, 1  ;;  %v488_v20 = vpop.permute.xlu0 %487  ;;  %v429_v63 = vsel %vm423_vm0, %v416_v19, %v417_v24  ;;  %v941_v0 = vmul.f32 %v884_v11, %v4182_v32  ;;  %v1037_v14 = vmul.f32 %v884_v11, %v526_v7 }
  0xed   :  { %846 = vst [vmem:[#allocation2 + $0xec] sm:$0xf] %v830_v17  ;;  %v692_v53 = vpack.c.bf16 %v676_v29, %v676_v29  ;;  %v529_v8 = vmul.f32 %v488_v20, %v429_v63  ;;  %v2937_v17 = vld [vmem:[#allocation2 + $0x144] sm:$0xf0] }
  0xee   :  { %752 = vst [vmem:[#allocation2 + $0x128] sm:$0xf] %v736_v52  ;;  %v428_v21 = vsel %vm423_vm0, %v417_v24, %v4931_v48  ;;  %v989_v52 = vmul.f32 %v884_v11, %v4150_v35  ;;  %v3441_v24 = vld [vmem:[#allocation2 + $0x124] sm:$0xf] }
  0xef   :  { %751 = vst [vmem:[#allocation2 + $0x104] sm:$0xf] %v735_v18  ;;  %v4386_v57 = vmul.f32 %v493_v56, %v428_v21  ;;  %v4390_v18 = vmul.f32 %v4058_v3, %v300_v27  ;;  %v833_v29 = vpack.c.bf16 %v529_v8, %v529_v8  ;;  %v2940_v35 = vor.u32 %v3441_v24, %v2937_v17  ;;  %v3445_v11 = vld [vmem:[#allocation2 + $0x140] sm:$0xf0] }
  0xf0   :  { %970 = vst [vmem:[#allocation2 + $0x60] sm:$0xf] %v954_v34  ;;  %v186_v34 = vpop.f32.mrf.mxu3  ;;  %v957_v3 = vpack.c.bf16 %v941_v0, %v941_v0  ;;  %v287_v0 = vrot.slane %v4363_v37, 7  ;;  %v4949_v24 = vrot.slane %v4121_v15, 1 }
  0xf1   :  { %1018 = vst [vmem:[#allocation2 + $0x64] sm:$0xf] %v1002_v60  ;;  %v722_v60 = vmul.f32 %v4089_v40, %v529_v8  ;;  %v187_v20 = vadd.f32 %v4043_v58, %v186_v34  ;;  %v723_v32 = vmul.f32 %v4013_v45, %v4386_v57  ;;  %v1005_v40 = vpack.c.bf16 %v989_v52, %v989_v52 }
  0xf2   :  { %1066 = vst [vmem:[#allocation2 + $0x68] sm:$0xf] %v1050_v43  ;;  %v834_v43 = vpack.c.bf16 %v4386_v57, %v4386_v57  ;;  %v627_v7 = vmul.f32 %v4013_v45, %v4390_v18  ;;  %v4404_v21 = vpop.permute.xlu1 %507 }
  0xf3   :  { %708 = vst [vmem:[#allocation2 + $0x1b4] sm:$0xf] %v692_v53  ;;  %v738_v56 = vpack.c.bf16 %v722_v60, %v722_v60  ;;  %v4398_v27 = vmax.f32 %v187_v20, 0.0  ;;  %v739_v63 = vpack.c.bf16 %v723_v32, %v723_v32  ;;  %v899_v17 = vpop.permute.xlu2 %898  ;;  %v3516_v60 = vld [vmem:[#allocation3 + $0x138] sm:$0xff] }
  0xf4   :  { %819 = vst [vmem:[#allocation2 + $0x19c] sm:$0xf] %v803_v5  ;;  %2185 = vmatmul.bf16.gmra.mxu2 %v2940_v35  ;;  %v1053_v5 = vpack.c.bf16 %v1037_v14, %v1037_v14  ;;  %v503_v45 = vpop.permute.xlu0 %502  ;;  %v944_v20 = vmul.f32 %v899_v17, %v4327_v54  ;;  %v4948_v14 = vrot.slane %v4154_v33, 1  ;;  %v992_v35 = vmul.f32 %v899_v17, %v4293_v62 }
  0xf5   :  { %849 = vst [vmem:[#allocation2 + $0x158] sm:$0xf] %v833_v29  ;;  %v677_v53 = vmul.f32 %v4170_v9, %v4398_v27  ;;  %v288_v34 = vrot.slane %v4398_v27, 7  ;;  %v3499_v29 = vld [vmem:[#allocation3 + $0xb0] sm:$0xff]  ;;  %v804_v52 = vpack.c.bf16 %v4398_v27, %v4398_v27  ;;  %2304 = vmatpush.bf16.msrb.mxu1 %v3516_v60  ;;  %v643_v33 = vpack.c.bf16 %v627_v7, %v627_v7 }
  0xf6   :  { %850 = vst [vmem:[#allocation2 + $0x17c] sm:$0xf] %v834_v43  ;;  %v436_v32 = vsel %vm423_vm0, %v4949_v24, %v4948_v14  ;;  %2207 = vmatpush.bf16.msrb.mxu3 %v3499_v29  ;;  %v1040_v54 = vmul.f32 %v899_v17, %v529_v8  ;;  %v960_v24 = vpack.c.bf16 %v944_v20, %v944_v20  ;;  %v419_v17 = vrot.slane %v4398_v27, 1 }
  0xf7   :  { %754 = vst [vmem:[#allocation2 + $0x170] sm:$0xf] %v738_v56  ;;  %v693_v43 = vpack.c.bf16 %v677_v53, %v677_v53  ;;  %v2935_v56 = vld [vmem:[#allocation2 + $0x120] sm:$0xf]  ;;  %v770_v53 = vpack.c.bf16 %v4390_v18, %v4390_v18  ;;  %v4431_v60 = vmul.f32 %v4130_v41, %v436_v32 }
  0xf8   :  { %755 = vst [vmem:[#allocation2 + $0x194] sm:$0xf] %v739_v63  ;;  %v298_v63 = vsel %vm294_vm1, %v287_v0, %v288_v34  ;;  %v188_v48 = vpop.f32.mrf.mxu3  ;;  %v2936_v38 = vor.u32 %v3445_v11, %v2935_v56  ;;  %v1056_v7 = vpack.c.bf16 %v1040_v54, %v1040_v54 }
  0xf9   :  { %973 = vst [vmem:[#allocation2 + $0xcc] sm:$0xf] %v957_v3  ;;  %v4425_v3 = vmul.f32 %v4128_v39, %v298_v63  ;;  %v189_v14 = vadd.f32 %v4043_v58, %v188_v48  ;;  %v3498_v63 = vld [vmem:[#allocation3 + $0xa8] sm:$0xff] }
  0xfa   :  { %1021 = vst [vmem:[#allocation2 + $0xd0] sm:$0xf] %v1005_v40  ;;  %2136 = vmatmul.bf16.gmra.mxu1 %v2936_v38  ;;  %v1008_v40 = vpack.c.bf16 %v992_v35, %v992_v35  ;;  %v2973_v35 = vld [vmem:[#allocation2 + $0x18c] sm:$0xf0]  ;;  %2208 = vmatpush.bf16.msrb.mxu3 %v3498_v63  ;;  %v3496_v63 = vld [vmem:[#allocation3 + $0x98] sm:$0xff] }
  0xfb   :  { %1069 = vst [vmem:[#allocation2 + $0xd4] sm:$0xf] %v1053_v5  ;;  %v4435_v8 = vmul.f32 %v4170_v9, %v4425_v3  ;;  %v4437_v39 = vmax.f32 %v189_v14, 0.0  ;;  %v715_v5 = vmul.f32 %v4096_v49, %v4431_v60 }
  0xfc   :  { %709 = vst [vmem:[#allocation2 + $0x1d8] sm:$0xf] %v693_v43  ;;  %v859_v38 = vpop.permute.xlu0 %858  ;;  %v864_v43 = vpop.permute.xlu1 %863 }
  0xfd   :  { %820 = vst [vmem:[#allocation2 + $0x1c0] sm:$0xf] %v804_v52  ;;  %v678_v48 = vmul.f32 %v4223_v6, %v4437_v39  ;;  %v420_v11 = vrot.slane %v4437_v39, 1  ;;  %v805_v41 = vpack.c.bf16 %v4437_v39, %v4437_v39  ;;  %v936_v52 = vmul.f32 %v859_v38, %v4238_v16 }
  0xfe   :  { %659 = vst [vmem:[#allocation2 + $0x18c] sm:$0xf] %v643_v33  ;;  %v984_v20 = vmul.f32 %v859_v38, %v4082_v28  ;;  %v1032_v32 = vmul.f32 %v859_v38, %v4276_v31  ;;  %v3515_v33 = vld [vmem:[#allocation3 + $0x130] sm:$0xff]  ;;  %v635_v28 = vpack.c.bf16 %v4257_v36, %v4257_v36  ;;  %v3450_v31 = vld [vmem:[#allocation2 + $0x16c] sm:$0xf]  ;;  %v937_v14 = vmul.f32 %v864_v43, %v4241_v4 }
  0xff   :  { %786 = vst [vmem:[#allocation2 + $0x174] sm:$0xf] %v770_v53  ;;  %v694_v29 = vpack.c.bf16 %v678_v48, %v678_v48  ;;  %v426_v49 = vsel %vm423_vm0, %v419_v17, %v420_v11  ;;  %v952_v54 = vpack.c.bf16 %v936_v52, %v936_v52  ;;  %2305 = vmatpush.bf16.msrb.mxu1 %v3515_v33 }
 0x100   :  { %976 = vst [vmem:[#allocation2 + $0x138] sm:$0xf] %v960_v24  ;;  %v191_v56 = vpop.f32.mrf.mxu3  ;;  %v1000_v16 = vpack.c.bf16 %v984_v20, %v984_v20  ;;  %v1048_v53 = vpack.c.bf16 %v1032_v32, %v1032_v32  ;;  %v532_v24 = vmul.f32 %v503_v45, %v426_v49  ;;  %v985_v48 = vmul.f32 %v864_v43, %v4121_v15 }
 0x101   :  { %1024 = vst [vmem:[#allocation2 + $0x13c] sm:$0xf] %v1008_v40  ;;  %v2976_v40 = vor.u32 %v3450_v31, %v2973_v35  ;;  %v762_v38 = vpack.c.bf16 %v4241_v4, %v4241_v4  ;;  %v192_v36 = vadd.f32 %v4043_v58, %v191_v56  ;;  %v826_v45 = vpack.c.bf16 %v4431_v60, %v4431_v60  ;;  %v2971_v35 = vld [vmem:[#allocation2 + $0x168] sm:$0xf] }
 0x102   :  { %1072 = vst [vmem:[#allocation2 + $0x140] sm:$0xf] %v1056_v7  ;;  %v731_v7 = vpack.c.bf16 %v715_v5, %v715_v5  ;;  %v953_v20 = vpack.c.bf16 %v937_v14, %v937_v14  ;;  %v914_v5 = vpop.permute.xlu2 %913  ;;  %v725_v15 = vmul.f32 %v4170_v9, %v532_v24  ;;  %v1001_v32 = vpack.c.bf16 %v985_v48, %v985_v48 }
 0x103   :  { %710 = vst [vmem:[#allocation2 + $0x1fc] sm:$0xf] %v694_v29  ;;  %v1033_v29 = vmul.f32 %v864_v43, %v4431_v60  ;;  %v4467_v43 = vmax.f32 %v192_v36, 0.0  ;;  %v645_v60 = vpack.c.bf16 %v4435_v8, %v4435_v8  ;;  %v947_v33 = vmul.f32 %v914_v5, %v4425_v3 }
 0x104   :  { %821 = vst [vmem:[#allocation2 + $0x1e4] sm:$0xf] %v805_v41  ;;  %2190 = vmatmul.bf16.gmra.mxu2 %v2976_v40  ;;  %v3497_v41 = vld [vmem:[#allocation3 + $0xa0] sm:$0xff]  ;;  %v741_v9 = vpack.c.bf16 %v725_v15, %v725_v15  ;;  %v772_v31 = vpack.c.bf16 %v4425_v3, %v4425_v3  ;;  %v1043_v14 = vmul.f32 %v914_v5, %v532_v24  ;;  %v3495_v3 = vld [vmem:[#allocation3 + $0x90] sm:$0xff] }
 0x105   :  { %968 = vst [vmem:[#allocation2 + $0x18] sm:$0xf] %v952_v54  ;;  %v3454_v52 = vld [vmem:[#allocation2 + $0x188] sm:$0xf0]  ;;  %v1049_v4 = vpack.c.bf16 %v1033_v29, %v1033_v29  ;;  %2209 = vmatpush.bf16.msrb.mxu3 %v3497_v41  ;;  %v3524_v54 = vld [vmem:[#allocation3 + $0x178] sm:$0xff]  ;;  %v836_v40 = vpack.c.bf16 %v532_v24, %v532_v24  ;;  %v679_v8 = vmul.f32 %v4215_v51, %v4467_v43  ;;  %v879_v29 = vpop.permute.xlu1 %878 }
 0x106   :  { %1016 = vst [vmem:[#allocation2 + $0x1c] sm:$0xf] %v1000_v16  ;;  %v2972_v56 = vor.u32 %v3454_v52, %v2971_v35  ;;  %v995_v16 = vmul.f32 %v914_v5, %v4398_v27  ;;  %2353 = vmatpush.bf16.msrb.mxu2 %v3524_v54  ;;  %v963_v48 = vpack.c.bf16 %v947_v33, %v947_v33  ;;  %v4950_v5 = vrot.slane %v4056_v1, 7  ;;  %v3459_v35 = vld [vmem:[#allocation2 + $0x1b4] sm:$0xf] }
 0x107   :  { %1064 = vst [vmem:[#allocation2 + $0x20] sm:$0xf] %v1048_v53  ;;  %v874_v53 = vpop.permute.xlu0 %873  ;;  %v1059_v41 = vpack.c.bf16 %v1043_v14, %v1043_v14  ;;  %v695_v52 = vpack.c.bf16 %v679_v8, %v679_v8  ;;  %v806_v15 = vpack.c.bf16 %v4467_v43, %v4467_v43 }
 0x108   :  { %651 = vst [vmem:[#allocation2 + $0x6c] sm:$0xf] %v635_v28  ;;  %v193_v49 = vpop.f32.mrf.mxu3  ;;  %v987_v24 = vmul.f32 %v874_v53, %v4076_v22 }
 0x109   :  { %747 = vst [vmem:[#allocation2 + $0x74] sm:$0xf] %v731_v7  ;;  %v194_v28 = vadd.f32 %v4043_v58, %v193_v49  ;;  %2210 = vmatpush.bf16.msrb.mxu3 %v3496_v63  ;;  %v939_v58 = vmul.f32 %v874_v53, %v4192_v42 }
 0x10a   :  { %778 = vst [vmem:[#allocation2 + $0x54] sm:$0xf] %v762_v38  ;;  %2141 = vmatmul.bf16.gmra.mxu1 %v2972_v56  ;;  %v1011_v38 = vpack.c.bf16 %v995_v16, %v995_v16  ;;  %v3494_v56 = vld [vmem:[#allocation3 + $0x88] sm:$0xff]  ;;  %v1003_v63 = vpack.c.bf16 %v987_v24, %v987_v24  ;;  %v4508_v14 = vpop.permute.xlu2 %928 }
 0x10b   :  { %842 = vst [vmem:[#allocation2 + $0x5c] sm:$0xf] %v826_v45  ;;  %v4478_v7 = vmax.f32 %v194_v28, 0.0  ;;  %v3009_v45 = vld [vmem:[#allocation2 + $0x1d4] sm:$0xf0]  ;;  %v3523_v28 = vld [vmem:[#allocation3 + $0x170] sm:$0xff] }
 0x10c   :  { %969 = vst [vmem:[#allocation2 + $0x3c] sm:$0xf] %v953_v20  ;;  %v1035_v20 = vmul.f32 %v874_v53, %v4316_v30  ;;  %v988_v30 = vmul.f32 %v879_v29, %v4117_v13  ;;  %v3012_v49 = vor.u32 %v3459_v35, %v3009_v45  ;;  %v4951_v13 = vrot.slane %v4263_v2, 1  ;;  %v3514_v53 = vld [vmem:[#allocation3 + $0x128] sm:$0xff]  ;;  %2354 = vmatpush.bf16.msrb.mxu2 %v3523_v28 }
 0x10d   :  { %1017 = vst [vmem:[#allocation2 + $0x40] sm:$0xf] %v1001_v32  ;;  %v291_v36 = vrot.slane %v4478_v7, 7  ;;  %v940_v32 = vmul.f32 %v879_v29, %v4142_v61  ;;  %2211 = vmatpush.bf16.msrb.mxu3 %v3495_v3  ;;  %v998_v62 = vmul.f32 %v4508_v14, %v4478_v7  ;;  %2306 = vmatpush.bf16.msrb.mxu1 %v3514_v53  ;;  %v894_v3 = vpop.permute.xlu1 %893  ;;  %v4952_v45 = vld [vmem:[#allocation10_spill] sm:$0xff] }
 0x10e   :  { %1065 = vst [vmem:[#allocation2 + $0x44] sm:$0xf] %v1049_v4  ;;  %v955_v4 = vpack.c.bf16 %v939_v58, %v939_v58  ;;  %v1051_v33 = vpack.c.bf16 %v1035_v20, %v1035_v20  ;;  %v430_v16 = vsel %vm423_vm0, %v4951_v13, %v416_v19  ;;  %v3522_v19 = vld [vmem:[#allocation3 + $0x168] sm:$0xff] }
 0x10f   :  { %661 = vst [vmem:[#allocation2 + $0x1d4] sm:$0xf] %v645_v60  ;;  %v310_v42 = vsel %vm294_vm1, %v291_v36, %v4950_v5  ;;  %v1036_v60 = vmul.f32 %v879_v29, %v4194_v46  ;;  %v889_v54 = vpop.permute.xlu0 %888  ;;  %v1004_v46 = vpack.c.bf16 %v988_v30, %v988_v30  ;;  %v528_v8 = vmul.f32 %v4217_v59, %v430_v16 }
 0x110   :  { %757 = vst [vmem:[#allocation2 + $0x1dc] sm:$0xf] %v741_v9  ;;  %v4494_v22 = vmul.f32 %v3928_v10, %v310_v42  ;;  %v956_v10 = vpack.c.bf16 %v940_v32, %v940_v32  ;;  %v664_v9 = vmul.f32 %v4017_v47, %v4478_v7  ;;  %v990_v29 = vmul.f32 %v889_v54, %v4211_v12  ;;  %v4954_v42 = vld [vmem:[#allocation17_spill] sm:$0xff] }
 0x111   :  { %788 = vst [vmem:[#allocation2 + $0x1bc] sm:$0xf] %v772_v31  ;;  %2212 = vmatpush.bf16.msrb.mxu3 %v3494_v56  ;;  %v1052_v31 = vpack.c.bf16 %v1036_v60, %v1036_v60  ;;  %v1038_v59 = vmul.f32 %v889_v54, %v4351_v23  ;;  %v1014_v24 = vpack.c.bf16 %v998_v62, %v998_v62  ;;  %v4955_v23 = vrot.slane %v4363_v37, 1  ;;  %v3513_v62 = vld [vmem:[#allocation3 + $0x120] sm:$0xff] }
 0x112   :  { %852 = vst [vmem:[#allocation2 + $0x1c4] sm:$0xf] %v836_v40  ;;  %v617_v61 = vmul.f32 %v4011_v44, %v4494_v22  ;;  %v3493_v44 = vld [vmem:[#allocation3 + $0x80] sm:$0xff]  ;;  %v760_v58 = vpack.c.bf16 %v4494_v22, %v4494_v22  ;;  %2355 = vmatpush.bf16.msrb.mxu2 %v3522_v19  ;;  %v1006_v5 = vpack.c.bf16 %v990_v29, %v990_v29  ;;  %v289_v60 = vrot.slane %v4437_v39, 7  ;;  %v4958_v19 = vld [vmem:[#allocation14_spill] sm:$0xff] }
 0x113   :  { %979 = vst [vmem:[#allocation2 + $0x1a4] sm:$0xf] %v963_v48  ;;  %v680_v48 = vpack.c.bf16 %v664_v9, %v664_v9  ;;  %v427_v35 = vsel %vm423_vm0, %v4955_v23, %v419_v17  ;;  %v991_v30 = vmul.f32 %v894_v3, %v4263_v2  ;;  %v421_v17 = vrot.slane %v4467_v43, 1  ;;  %2307 = vmatpush.bf16.msrb.mxu1 %v3513_v62  ;;  %v3511_v23 = vld [vmem:[#allocation3 + $0x110] sm:$0xff] }
 0x114   :  { %1027 = vst [vmem:[#allocation2 + $0x1a8] sm:$0xf] %v1011_v38  ;;  %2195 = vmatmul.bf16.gmra.mxu2 %v3012_v49  ;;  %v633_v40 = vpack.c.bf16 %v617_v61, %v617_v61  ;;  %v942_v38 = vmul.f32 %v889_v54, %v4244_v50  ;;  %v4953_v50 = vrot.slane %v4335_v25, 7  ;;  %v4957_v54 = vld [vmem:[#allocation15_spill] sm:$0xff] }
 0x115   :  { %1075 = vst [vmem:[#allocation2 + $0x1ac] sm:$0xf] %v1059_v41  ;;  %2213 = vmatpush.bf16.msrb.mxu3 %v3493_v44  ;;  %v807_v41 = vpack.c.bf16 %v4478_v7, %v4478_v7  ;;  %v1007_v13 = vpack.c.bf16 %v991_v30, %v991_v30  ;;  %v909_v28 = vpop.permute.xlu1 %908  ;;  %v4960_v30 = vld [vmem:[#allocation9_spill] sm:$0xff]  ;;  %v3407_v62 = vld [vmem:[#allocation2 + $0x14] sm:$0xf] }
 0x116   :  { %711 = vst [vmem:[#allocation2 + $0x220] sm:$0xf] %v695_v52  ;;  %v721_v52 = vmul.f32 %v4952_v45, %v528_v8  ;;  %v299_v20 = vsel %vm294_vm1, %v4953_v50, %v287_v0  ;;  %v958_v12 = vpack.c.bf16 %v942_v38, %v942_v38  ;;  %v4956_v0 = vld [vmem:[#allocation13_spill] sm:$0xff]  ;;  %v3512_v45 = vld [vmem:[#allocation3 + $0x118] sm:$0xff] }
 0x117   :  { %822 = vst [vmem:[#allocation2 + $0x208] sm:$0xf] %v806_v15  ;;  %v943_v15 = vmul.f32 %v894_v3, %v4954_v42  ;;  %v904_v32 = vpop.permute.xlu0 %903  ;;  %v4536_v49 = vmul.f32 %v4956_v0, %v299_v20  ;;  %2308 = vmatpush.bf16.msrb.mxu1 %v3512_v45 }
 0x118   :  { %971 = vst [vmem:[#allocation2 + $0x84] sm:$0xf] %v955_v4  ;;  %v1054_v4 = vpack.c.bf16 %v1038_v59, %v1038_v59  ;;  %v737_v56 = vpack.c.bf16 %v721_v52, %v721_v52  ;;  %v945_v61 = vmul.f32 %v904_v32, %v4390_v18  ;;  %v993_v2 = vmul.f32 %v904_v32, %v4335_v25 }
 0x119   :  { %1019 = vst [vmem:[#allocation2 + $0x88] sm:$0xf] %v1003_v63  ;;  %v1039_v63 = vmul.f32 %v894_v3, %v528_v8  ;;  %v959_v9 = vpack.c.bf16 %v943_v15, %v943_v15  ;;  %v1041_v16 = vmul.f32 %v904_v32, %v4386_v57  ;;  %v297_v18 = vsel %vm294_vm1, %v288_v34, %v289_v60  ;;  %v3520_v3 = vld [vmem:[#allocation3 + $0x158] sm:$0xff]  ;;  %v3519_v32 = vld [vmem:[#allocation3 + $0x150] sm:$0xff] }
 0x11a   :  { %1067 = vst [vmem:[#allocation2 + $0x8c] sm:$0xf] %v1051_v33  ;;  %v832_v33 = vpack.c.bf16 %v528_v8, %v528_v8  ;;  %v961_v44 = vpack.c.bf16 %v945_v61, %v945_v61  ;;  %v425_v57 = vsel %vm423_vm0, %v420_v11, %v421_v17  ;;  %v946_v34 = vmul.f32 %v909_v28, %v4536_v49 }
 0x11b   :  { %972 = vst [vmem:[#allocation2 + $0xa8] sm:$0xf] %v956_v10  ;;  %v4541_v10 = vmul.f32 %v4957_v54, %v427_v35  ;;  %v1055_v53 = vpack.c.bf16 %v1039_v63, %v1039_v63  ;;  %v1057_v27 = vpack.c.bf16 %v1041_v16, %v1041_v16  ;;  %v290_v11 = vrot.slane %v4467_v43, 7  ;;  %v4961_v63 = vld [vmem:[#allocation11_spill] sm:$0xff]  ;;  %v4962_v54 = vld [vmem:[#allocation16_spill] sm:$0xff]  ;;  %2309 = vmatpush.bf16.msrb.mxu1 %v3511_v23 }
 0x11c   :  { %1020 = vst [vmem:[#allocation2 + $0xac] sm:$0xf] %v1004_v46  ;;  %v628_v46 = vmul.f32 %v4033_v55, %v4536_v49  ;;  %v994_v59 = vmul.f32 %v909_v28, %v4363_v37  ;;  %v771_v52 = vpack.c.bf16 %v4536_v49, %v4536_v49  ;;  %v4964_v23 = vld [vmem:[#allocation12_spill] sm:$0xff] }
 0x11d   :  { %1068 = vst [vmem:[#allocation2 + $0xb0] sm:$0xf] %v1052_v31  ;;  %v724_v25 = vmul.f32 %v4033_v55, %v4541_v10  ;;  %v1009_v31 = vpack.c.bf16 %v993_v2, %v993_v2  ;;  %v3468_v55 = vld [vmem:[#allocation2 + $0x1fc] sm:$0xf]  ;;  %v3045_v38 = vld [vmem:[#allocation2 + $0x21c] sm:$0xf0]  ;;  %v835_v50 = vpack.c.bf16 %v4541_v10, %v4541_v10  ;;  %v295_v37 = vsel %vm294_vm1, %v290_v11, %v291_v36 }
 0x11e   :  { %649 = vst [vmem:[#allocation2 + $0x24] sm:$0xf] %v633_v40  ;;  %v3521_v40 = vld [vmem:[#allocation3 + $0x160] sm:$0xff]  ;;  %v644_v8 = vpack.c.bf16 %v628_v46, %v628_v46  ;;  %v3048_v29 = vor.u32 %v3468_v55, %v3045_v38  ;;  %v296_v15 = vsel %vm294_vm1, %v289_v60, %v290_v11  ;;  %v1010_v35 = vpack.c.bf16 %v994_v59, %v994_v59  ;;  %v3463_v2 = vld [vmem:[#allocation2 + $0x1d0] sm:$0xf0] }
 0x11f   :  { %696 = vst [vmem:[#allocation2 + $0x4] sm:$0xf] %v680_v48  ;;  %v4562_v48 = vmul.f32 %v4958_v19, %v297_v18  ;;  %2356 = vmatpush.bf16.msrb.mxu2 %v3521_v40  ;;  %v4590_v0 = vmul.f32 %v4960_v30, %v295_v37  ;;  %v405_v60 = vmul.f32 %v4961_v63, %v296_v15  ;;  %v2809_v19 = vld [vmem:[#allocation2 + $0x34] sm:$0xf0]  ;;  %v2845_v63 = vld [vmem:[#allocation2 + $0x7c] sm:$0xf0] }
 0x120   :  { %776 = vst [vmem:[#allocation2 + $0xc] sm:$0xf] %v760_v58  ;;  %v4565_v58 = vmul.f32 %v4404_v21, %v425_v57  ;;  %v1042_v21 = vmul.f32 %v909_v28, %v4541_v10  ;;  %v2812_v11 = vor.u32 %v3407_v62, %v2809_v19  ;;  %v2881_v62 = vld [vmem:[#allocation2 + $0xc4] sm:$0xf0] }
 0x121   :  { %823 = vst [vmem:[#allocation2 + $0x22c] sm:$0xf] %v807_v41  ;;  %v740_v41 = vpack.c.bf16 %v724_v25, %v724_v25  ;;  %v630_v20 = vmul.f32 %v4223_v6, %v4562_v48  ;;  %v773_v26 = vpack.c.bf16 %v4562_v48, %v4562_v48  ;;  %v631_v18 = vmul.f32 %v4215_v51, %v405_v60 }
 0x122   :  { %1030 = vst [vmem:[#allocation2 + $0x214] sm:$0xf] %v1014_v24  ;;  %v422_v24 = vrot.slane %v4478_v7, 1  ;;  %v726_v42 = vmul.f32 %v4223_v6, %v4565_v58  ;;  %v4959_v7 = vrot.slane %v4056_v1, 1  ;;  %v837_v46 = vpack.c.bf16 %v4565_v58, %v4565_v58 }
 0x123   :  { %974 = vst [vmem:[#allocation2 + $0xf0] sm:$0xf] %v958_v12  ;;  %v962_v12 = vpack.c.bf16 %v946_v34, %v946_v34  ;;  %2357 = vmatpush.bf16.msrb.mxu2 %v3520_v3  ;;  %v646_v49 = vpack.c.bf16 %v630_v20, %v630_v20  ;;  %v3510_v34 = vld [vmem:[#allocation3 + $0x108] sm:$0xff]  ;;  %v647_v55 = vpack.c.bf16 %v631_v18, %v631_v18  ;;  %v3504_v18 = vld [vmem:[#allocation3 + $0xd8] sm:$0xff] }
 0x124   :  { %1022 = vst [vmem:[#allocation2 + $0xf4] sm:$0xf] %v1006_v5  ;;  %2200 = vmatmul.bf16.gmra.mxu2 %v3048_v29  ;;  %v919_v5 = vpop.permute.xlu0 %918  ;;  %v439_v36 = vsel %vm423_vm0, %v422_v24, %v4959_v7  ;;  %v424_v6 = vsel %vm423_vm0, %v421_v17, %v422_v24  ;;  %2310 = vmatpush.bf16.msrb.mxu1 %v3510_v34 }
 0x125   :  { %1070 = vst [vmem:[#allocation2 + $0xf8] sm:$0xf] %v1054_v4  ;;  %v1058_v4 = vpack.c.bf16 %v1042_v21, %v1042_v21  ;;  %v996_v61 = vmul.f32 %v919_v5, %v4437_v39  ;;  %v4600_v10 = vmul.f32 %v4962_v54, %v439_v36  ;;  %v1044_v17 = vmul.f32 %v919_v5, %v4565_v58 }
 0x126   :  { %753 = vst [vmem:[#allocation2 + $0x14c] sm:$0xf] %v737_v56  ;;  %v948_v56 = vmul.f32 %v919_v5, %v4562_v48  ;;  %v616_v39 = vmul.f32 %v4017_v47, %v4590_v0  ;;  %v924_v48 = vpop.permute.xlu1 %923  ;;  %v775_v3 = vpack.c.bf16 %v4590_v0, %v4590_v0 }
 0x127   :  { %848 = vst [vmem:[#allocation2 + $0x134] sm:$0xf] %v832_v33  ;;  %v742_v33 = vpack.c.bf16 %v726_v42, %v726_v42  ;;  %2358 = vmatpush.bf16.msrb.mxu2 %v3519_v32  ;;  %v1012_v25 = vpack.c.bf16 %v996_v61, %v996_v61  ;;  %v712_v57 = vmul.f32 %v4017_v47, %v4600_v10  ;;  %v3509_v47 = vld [vmem:[#allocation3 + $0x100] sm:$0xff]  ;;  %v3507_v61 = vld [vmem:[#allocation3 + $0xf0] sm:$0xff] }
 0x128   :  { %975 = vst [vmem:[#allocation2 + $0x114] sm:$0xf] %v959_v9  ;;  %v3518_v9 = vld [vmem:[#allocation3 + $0x148] sm:$0xff]  ;;  %v964_v28 = vpack.c.bf16 %v948_v56, %v948_v56  ;;  %v949_v29 = vmul.f32 %v924_v48, %v405_v60  ;;  %v997_v24 = vmul.f32 %v924_v48, %v4467_v43  ;;  %2311 = vmatpush.bf16.msrb.mxu1 %v3509_v47 }
 0x129   :  { %1023 = vst [vmem:[#allocation2 + $0x118] sm:$0xf] %v1007_v13  ;;  %v4963_v13 = vld [vmem:[#allocation18_spill] sm:$0xff]  ;;  %v728_v38 = vpack.c.bf16 %v712_v57, %v712_v57  ;;  %v1046_v20 = vmul.f32 %v4508_v14, %v4600_v10 }
 0x12a   :  { %1071 = vst [vmem:[#allocation2 + $0x11c] sm:$0xf] %v1055_v53  ;;  %v534_v16 = vmul.f32 %v4963_v13, %v424_v6  ;;  %v1013_v42 = vpack.c.bf16 %v997_v24, %v997_v24  ;;  %v2835_v13 = vld [vmem:[#allocation2 + $0x50] sm:$0xf] }
 0x12b   :  { %977 = vst [vmem:[#allocation2 + $0x15c] sm:$0xf] %v961_v44  ;;  %2359 = vmatpush.bf16.msrb.mxu2 %v3518_v9  ;;  %v1062_v7 = vpack.c.bf16 %v1046_v20, %v1046_v20  ;;  %v2827_v9 = vld [vmem:[#allocation2 + $0x48] sm:$0xf]  ;;  %v3548_v20 = vld [vmem:[#allocation3 + $0x238] sm:$0xff] }
 0x12c   :  { %1025 = vst [vmem:[#allocation2 + $0x160] sm:$0xf] %v1009_v31  ;;  %v1060_v31 = vpack.c.bf16 %v1044_v17, %v1044_v17  ;;  %v727_v40 = vmul.f32 %v4215_v51, %v534_v16  ;;  %v774_v51 = vpack.c.bf16 %v405_v60, %v405_v60  ;;  %v838_v59 = vpack.c.bf16 %v534_v16, %v534_v16  ;;  %v934_v45 = vpop.permute.xlu0 %933  ;;  %v3508_v60 = vld [vmem:[#allocation3 + $0xf8] sm:$0xff]  ;;  %v3411_v17 = vld [vmem:[#allocation2 + $0x30] sm:$0xf0] }
 0x12d   :  { %1073 = vst [vmem:[#allocation2 + $0x164] sm:$0xf] %v1057_v27  ;;  %v632_v27 = vpack.c.bf16 %v616_v39, %v616_v39  ;;  %v1045_v21 = vmul.f32 %v924_v48, %v534_v16  ;;  %v951_v5 = vmul.f32 %v934_v45, %v4494_v22  ;;  %v999_v43 = vmul.f32 %v934_v45, %v4056_v1  ;;  %v3419_v16 = vld [vmem:[#allocation2 + $0x70] sm:$0xf0]  ;;  %v3502_v48 = vld [vmem:[#allocation3 + $0xc8] sm:$0xff] }
 0x12e   :  { %660 = vst [vmem:[#allocation2 + $0x1b0] sm:$0xf] %v644_v8  ;;  %v3517_v8 = vld [vmem:[#allocation3 + $0x140] sm:$0xff]  ;;  %v743_v58 = vpack.c.bf16 %v727_v40, %v727_v40  ;;  %v3532_v40 = vld [vmem:[#allocation3 + $0x1b8] sm:$0xff]  ;;  %2500 = vmatpush.bf16.msra.mxu1 %v3548_v20 }
 0x12f   :  { %756 = vst [vmem:[#allocation2 + $0x1b8] sm:$0xf] %v740_v41  ;;  %2360 = vmatpush.bf16.msrb.mxu2 %v3517_v8  ;;  %v950_v41 = vmul.f32 %v4508_v14, %v4590_v0  ;;  %v1061_v15 = vpack.c.bf16 %v1045_v21, %v1045_v21  ;;  %v967_v0 = vpack.c.bf16 %v951_v5, %v951_v5  ;;  %v3503_v8 = vld [vmem:[#allocation3 + $0xd0] sm:$0xff]  ;;  %v3528_v20 = vld [vmem:[#allocation3 + $0x198] sm:$0xff] }
 0x130   :  { %787 = vst [vmem:[#allocation2 + $0x198] sm:$0xf] %v771_v52  ;;  %v839_v52 = vpack.c.bf16 %v4600_v10, %v4600_v10  ;;  %v3506_v10 = vld [vmem:[#allocation3 + $0xe8] sm:$0xff]  ;;  %2402 = vmatpush.bf16.msra.mxu3 %v3532_v40  ;;  %v2917_v21 = vld [vmem:[#allocation2 + $0x10c] sm:$0xf0] }
 0x131   :  { %851 = vst [vmem:[#allocation2 + $0x1a0] sm:$0xf] %v835_v50  ;;  %v965_v50 = vpack.c.bf16 %v949_v29, %v949_v29  ;;  %v966_v37 = vpack.c.bf16 %v950_v41, %v950_v41  ;;  %v2843_v29 = vld [vmem:[#allocation2 + $0x58] sm:$0xf]  ;;  %v3501_v41 = vld [vmem:[#allocation3 + $0xc0] sm:$0xff]  ;;  %v3546_v40 = vld [vmem:[#allocation3 + $0x228] sm:$0xff] }
 0x132   :  { %978 = vst [vmem:[#allocation2 + $0x180] sm:$0xf] %v962_v12  ;;  %v3409_v12 = vld [vmem:[#allocation2 + $0x20] sm:$0xf0] }
 0x133   :  { %1026 = vst [vmem:[#allocation2 + $0x184] sm:$0xf] %v1010_v35  ;;  %v1047_v35 = vmul.f32 %v934_v45, %v4964_v23  ;;  %v2829_v23 = vld [vmem:[#allocation2 + $0x6c] sm:$0xf0] }
 0x134   :  { %1074 = vst [vmem:[#allocation2 + $0x188] sm:$0xf] %v1058_v4  ;;  %2361 = vmatmul.bf16.vlgmr.msrb.gmra.mxu2 %v2812_v11  ;;  %v3410_v4 = vld [vmem:[#allocation2 + $0x28] sm:$0xf0]  ;;  %v2871_v11 = vld [vmem:[#allocation2 + $0x98] sm:$0xf] }
 0x135   :  { %v3007_v53 = vld [vmem:[#allocation2 + $0x1b0] sm:$0xf]  ;;  %662 = vst [vmem:[#allocation2 + $0x1f8] sm:$0xf] %v646_v49  ;;  %v1015_v49 = vpack.c.bf16 %v999_v43, %v999_v43  ;;  %v1063_v1 = vpack.c.bf16 %v1047_v35, %v1047_v35 }
 0x136   :  { %v3008_v44 = vor.u32 %v3463_v2, %v3007_v53  ;;  %758 = vst [vmem:[#allocation2 + $0x200] sm:$0xf] %v742_v33  ;;  %v3416_v33 = vld [vmem:[#allocation2 + $0x5c] sm:$0xf]  ;;  %v3418_v2 = vld [vmem:[#allocation2 + $0x68] sm:$0xf0]  ;;  %v2836_v53 = vor.u32 %v3419_v16, %v2835_v13 }
 0x137   :  { %789 = vst [vmem:[#allocation2 + $0x1e0] sm:$0xf] %v773_v26  ;;  %v2848_v54 = vor.u32 %v3416_v33, %v2845_v63  ;;  %v2807_v26 = vld [vmem:[#allocation2 + $0x10] sm:$0xf]  ;;  %v2828_v39 = vor.u32 %v3418_v2, %v2827_v9  ;;  %v3530_v63 = vld [vmem:[#allocation3 + $0x1a8] sm:$0xff] }
 0x138   :  { %2146 = vmatmul.bf16.gmra.mxu1 %v3008_v44  ;;  %853 = vst [vmem:[#allocation2 + $0x1e8] sm:$0xf] %v837_v46  ;;  %v3505_v46 = vld [vmem:[#allocation3 + $0xe0] sm:$0xff]  ;;  %v3406_v2 = vld [vmem:[#allocation2 + $0xc] sm:$0xf] }
 0x139   :  { %980 = vst [vmem:[#allocation2 + $0x1c8] sm:$0xf] %v964_v28  ;;  %v2808_v28 = vor.u32 %v3411_v17, %v2807_v26  ;;  %v3425_v44 = vld [vmem:[#allocation2 + $0xa4] sm:$0xf]  ;;  %v2943_v13 = vld [vmem:[#allocation2 + $0x128] sm:$0xf] }
 0x13a   :  { %1028 = vst [vmem:[#allocation2 + $0x1cc] sm:$0xf] %v1012_v25  ;;  %v4629_v25 = vld [vmem:[%s4912_s4] ss:$0 sm:$0xff]  ;;  %v2884_v34 = vor.u32 %v3425_v44, %v2881_v62  ;;  %v2801_v16 = vld [vmem:[#allocation2 + $0x2c] sm:$0xf0] }
 0x13b   :  { %1076 = vst [vmem:[#allocation2 + $0x1d0] sm:$0xf] %v1060_v31  ;;  %v3529_v62 = vld [vmem:[#allocation3 + $0x1a0] sm:$0xff] }
 0x13c   :  { %648 = vst [vmem:[#allocation2] sm:$0xf] %v632_v27  ;;  %v3043_v6 = vld [vmem:[#allocation2 + $0x1f8] sm:$0xf] }
 0x13d   :  { %663 = vst [vmem:[#allocation2 + $0x21c] sm:$0xf] %v647_v55  ;;  %v3405_v55 = vld [vmem:[#allocation2 + $0x4] sm:$0xf] }
 0x13e   :  { %744 = vst [vmem:[#allocation2 + $0x8] sm:$0xf] %v728_v38 }
 0x13f   :  { %759 = vst [vmem:[#allocation2 + $0x224] sm:$0xf] %v743_v58  ;;  %v2793_v58 = vld [vmem:[#allocation2 + $0x24] sm:$0xf0] }
 0x140   :  { %790 = vst [vmem:[#allocation2 + $0x204] sm:$0xf] %v774_v51  ;;  %v3428_v51 = vld [vmem:[#allocation2 + $0xb8] sm:$0xf0] }
 0x141   :  { %791 = vst [vmem:[#allocation2 + $0x228] sm:$0xf] %v775_v3  ;;  %v3420_v3 = vld [vmem:[#allocation2 + $0x78] sm:$0xf0]  ;;  %v2872_v24 = vor.u32 %v3428_v51, %v2871_v11  ;;  %v3415_v11 = vld [vmem:[#allocation2 + $0x54] sm:$0xf] }
 0x142   :  { %854 = vst [vmem:[#allocation2 + $0x20c] sm:$0xf] %v838_v59  ;;  %v2796_v59 = vor.u32 %v3405_v55, %v2793_v58  ;;  %v2844_v45 = vor.u32 %v3420_v3, %v2843_v29  ;;  %v2837_v51 = vld [vmem:[#allocation2 + $0x74] sm:$0xf0]  ;;  %v2979_v29 = vld [vmem:[#allocation2 + $0x170] sm:$0xf] }
 0x143   :  { %855 = vst [vmem:[#allocation2 + $0x230] sm:$0xf] %v839_v52  ;;  %v2791_v32 = vld [vmem:[#allocation2] sm:$0xf]  ;;  %v3434_v52 = vld [vmem:[#allocation2 + $0xec] sm:$0xf] }
 0x144   :  { %981 = vst [vmem:[#allocation2 + $0x1ec] sm:$0xf] %v965_v50  ;;  %v2792_v36 = vor.u32 %v3409_v12, %v2791_v32  ;;  %v3472_v30 = vld [vmem:[#allocation2 + $0x218] sm:$0xf0]  ;;  %2366 = vmatmul.bf16.gmra.mxu2 %v2848_v54  ;;  %v2920_v43 = vor.u32 %v3434_v52, %v2917_v21  ;;  %v3414_v32 = vld [vmem:[#allocation2 + $0x4c] sm:$0xf] }
 0x145   :  { %982 = vst [vmem:[#allocation2 + $0x210] sm:$0xf] %v966_v37  ;;  %v2799_v14 = vld [vmem:[#allocation2 + $0x8] sm:$0xf]  ;;  %v3044_v56 = vor.u32 %v3472_v30, %v3043_v6  ;;  %v3540_v50 = vld [vmem:[#allocation3 + $0x1f8] sm:$0xff]  ;;  %v3531_v37 = vld [vmem:[#allocation3 + $0x1b0] sm:$0xff]  ;;  %v2832_v30 = vor.u32 %v3414_v32, %v2829_v23 }
 0x146   :  { %1029 = vst [vmem:[#allocation2 + $0x1f0] sm:$0xf] %v1013_v42  ;;  %2116 = vmatmul.bf16.vlgmr.msrb.gmra.mxu0 %v2792_v36  ;;  %v2800_v22 = vor.u32 %v3410_v4, %v2799_v14  ;;  %2403 = vmatpush.bf16.msra.mxu3 %v3531_v37  ;;  %v3437_v36 = vld [vmem:[#allocation2 + $0x100] sm:$0xf0]  ;;  %v2907_v14 = vld [vmem:[#allocation2 + $0xe0] sm:$0xf] }
 0x147   :  { %1077 = vst [vmem:[#allocation2 + $0x1f4] sm:$0xf] %v1061_v15  ;;  %2255 = vmatpush.bf16.msrb.mxu0 %v3508_v60  ;;  %v3429_v4 = vld [vmem:[#allocation2 + $0xc0] sm:$0xf0]  ;;  %v2908_v6 = vor.u32 %v3437_v36, %v2907_v14  ;;  %v3455_v3 = vld [vmem:[#allocation2 + $0x190] sm:$0xf0] }
 0x148   :  { %1078 = vst [vmem:[#allocation2 + $0x218] sm:$0xf] %v1062_v7  ;;  %2214 = vmatmul.bf16.vlgmr.msrb.gmra.mxu3 %v2800_v22  ;;  %2151 = vmatmul.bf16.gmra.mxu1 %v3044_v56  ;;  %v3539_v56 = vld [vmem:[#allocation3 + $0x1f0] sm:$0xff]  ;;  %v3025_v21 = vld [vmem:[#allocation2 + $0x1e4] sm:$0xf0]  ;;  %v3545_v37 = vld [vmem:[#allocation3 + $0x220] sm:$0xff] }
 0x149   :  { %983 = vst [vmem:[#allocation2 + $0x234] sm:$0xf] %v967_v0  ;;  %v2879_v0 = vld [vmem:[#allocation2 + $0xa0] sm:$0xf]  ;;  %v3424_v32 = vld [vmem:[#allocation2 + $0x9c] sm:$0xf] }
 0x14a   :  { %1031 = vst [vmem:[#allocation2 + $0x238] sm:$0xf] %v1015_v49  ;;  %v2880_v22 = vor.u32 %v3429_v4, %v2879_v0  ;;  %v2953_v49 = vld [vmem:[#allocation2 + $0x154] sm:$0xf0]  ;;  %2404 = vmatpush.bf16.msra.mxu3 %v3530_v63  ;;  %v3464_v23 = vld [vmem:[#allocation2 + $0x1d8] sm:$0xf0] }
 0x14b   :  { %1079 = vst [vmem:[#allocation2 + $0x23c] sm:$0xf] %v1063_v1  ;;  %2256 = vmatpush.bf16.msrb.mxu0 %v3507_v61  ;;  %v3547_v1 = vld [vmem:[#allocation3 + $0x230] sm:$0xff]  ;;  %v2873_v36 = vld [vmem:[#allocation2 + $0xbc] sm:$0xf0]  ;;  %v3536_v63 = vld [vmem:[#allocation3 + $0x1d8] sm:$0xff] }
 0x14c   :  { %2501 = vmatpush.bf16.msra.mxu1 %v3547_v1  ;;  %v3443_v61 = vld [vmem:[#allocation2 + $0x134] sm:$0xf]  ;;  %v3456_v4 = vld [vmem:[#allocation2 + $0x198] sm:$0xf0]  ;;  %v3525_v14 = vld [vmem:[#allocation3 + $0x180] sm:$0xff] }
 0x14d   :  { %v3015_v0 = vld [vmem:[#allocation2 + $0x1b8] sm:$0xf]  ;;  %v3470_v1 = vld [vmem:[#allocation2 + $0x20c] sm:$0xf] }
 0x14e   :  { %2405 = vmatpush.bf16.msra.mxu3 %v3529_v62 }
 0x14f   :  { %2257 = vmatpush.bf16.msrb.mxu0 %v3506_v10  ;;  %v2956_v10 = vor.u32 %v3443_v61, %v2953_v49 }
 0x150   :  { %2502 = vmatpush.bf16.msra.mxu1 %v3546_v40 }
 0x152   :  { %2406 = vmatpush.bf16.msra.mxu3 %v3528_v20 }
 0x153   :  { %2258 = vmatpush.bf16.msrb.mxu0 %v3505_v46  ;;  %v3438_v46 = vld [vmem:[#allocation2 + $0x108] sm:$0xf0] }
 0x154   :  { %2371 = vmatmul.bf16.gmra.mxu2 %v2884_v34  ;;  %v3452_v34 = vld [vmem:[#allocation2 + $0x17c] sm:$0xf]  ;;  %2503 = vmatpush.bf16.msra.mxu1 %v3545_v37 }
 0x155   :  { %v2127_v57 = vpop.f32.mrf.mxu1  ;;  %v2176_v31 = vpop.f32.mrf.mxu2 }
 0x156   :  { %2121 = vmatmul.bf16.gmra.mxu0 %v2828_v39  ;;  %v2128_v27 = vadd.f32 %v4629_v25, %v2127_v57  ;;  %v2804_v39 = vor.u32 %v3406_v2, %v2801_v16  ;;  %v2989_v57 = vld [vmem:[#allocation2 + $0x19c] sm:$0xf0]  ;;  %v3433_v16 = vld [vmem:[#allocation2 + $0xe4] sm:$0xf] }
 0x157   :  { %2259 = vmatpush.bf16.msrb.mxu0 %v3504_v18  ;;  %v2992_v55 = vor.u32 %v3452_v34, %v2989_v57  ;;  %v3542_v34 = vld [vmem:[#allocation3 + $0x208] sm:$0xff] }
 0x158   :  { %2219 = vmatmul.bf16.gmra.mxu3 %v2836_v53  ;;  %2312 = vmatmul.bf16.vlgmr.msrb.gmra.mxu1 %v2808_v28  ;;  %v4632_v19 = vadd.f32 %v2176_v31, %v2128_v27  ;;  %v3446_v53 = vld [vmem:[#allocation2 + $0x148] sm:$0xf0]  ;;  %v2915_v28 = vld [vmem:[#allocation2 + $0xe8] sm:$0xf] }
 0x159   :  { %v2944_v18 = vor.u32 %v3446_v53, %v2943_v13  ;;  %v2916_v44 = vor.u32 %v3438_v46, %v2915_v28  ;;  %v3538_v31 = vld [vmem:[#allocation3 + $0x1e8] sm:$0xff]  ;;  %v3473_v13 = vld [vmem:[#allocation2 + $0x220] sm:$0xf0]  ;;  %v3543_v53 = vld [vmem:[#allocation3 + $0x210] sm:$0xff] }
 0x15a   :  { %v3465_v46 = vld [vmem:[#allocation2 + $0x1e0] sm:$0xf0]  ;;  %v3051_v28 = vld [vmem:[#allocation2 + $0x200] sm:$0xf] }
 0x15b   :  { %2260 = vmatpush.bf16.msrb.mxu0 %v3503_v8  ;;  %v3052_v57 = vor.u32 %v3473_v13, %v3051_v28  ;;  %v3017_v13 = vld [vmem:[#allocation2 + $0x1dc] sm:$0xf0]  ;;  %v2887_v28 = vld [vmem:[#allocation2 + $0xa8] sm:$0xf] }
 0x15d   :  { %v4634_v38 = vpop.f32.mrf.mxu1  ;;  %v4636_v47 = vpop.f32.mrf.mxu2 }
 0x15f   :  { %2261 = vmatpush.bf16.msrb.mxu0 %v3502_v48 }
 0x163   :  { %2262 = vmatpush.bf16.msrb.mxu0 %v3501_v41  ;;  %v3447_v41 = vld [vmem:[#allocation2 + $0x150] sm:$0xf0] }
 0x164   :  { %2376 = vmatmul.bf16.gmra.mxu2 %v2920_v43  ;;  %v3526_v43 = vld [vmem:[#allocation3 + $0x188] sm:$0xff] }
 0x166   :  { %2165 = vmatmul.bf16.vlgmr.msra.gmra.mxu0 %v2796_v59  ;;  %v2132_v12 = vpop.f32.mrf.mxu1  ;;  %v2840_v59 = vor.u32 %v3415_v11, %v2837_v51  ;;  %v2945_v11 = vld [vmem:[#allocation2 + $0x14c] sm:$0xf0]  ;;  %v3442_v51 = vld [vmem:[#allocation2 + $0x12c] sm:$0xf] }
 0x167   :  { %v2181_v5 = vpop.f32.mrf.mxu2  ;;  %2451 = vmatpush.bf16.msra.mxu0 %v3540_v50  ;;  %v2133_v42 = vadd.f32 %v4629_v25, %v2132_v12  ;;  %v3537_v50 = vld [vmem:[#allocation3 + $0x1e0] sm:$0xff] }
 0x168   :  { %2224 = vmatmul.bf16.gmra.mxu3 %v2872_v24  ;;  %2317 = vmatmul.bf16.gmra.mxu1 %v2844_v45  ;;  %v2951_v24 = vld [vmem:[#allocation2 + $0x130] sm:$0xf]  ;;  %v2980_v45 = vor.u32 %v3455_v3, %v2979_v29  ;;  %v3461_v12 = vld [vmem:[#allocation2 + $0x1c4] sm:$0xf]  ;;  %v2815_v3 = vld [vmem:[#allocation2 + $0x18] sm:$0xf] }
 0x169   :  { %v4639_v15 = vadd.f32 %v2181_v5, %v2133_v42  ;;  %v2952_v52 = vor.u32 %v3447_v41, %v2951_v24  ;;  %v3527_v5 = vld [vmem:[#allocation3 + $0x190] sm:$0xff]  ;;  %v3028_v42 = vor.u32 %v3461_v12, %v3025_v21  ;;  %v3412_v41 = vld [vmem:[#allocation2 + $0x38] sm:$0xf0]  ;;  %v2948_v24 = vor.u32 %v3442_v51, %v2945_v11  ;;  %v3059_v21 = vld [vmem:[#allocation2 + $0x208] sm:$0xf] }
 0x16a   :  { %2407 = vmatpush.bf16.msra.mxu3 %v3527_v5  ;;  %v3534_v5 = vld [vmem:[#allocation3 + $0x1c8] sm:$0xff] }
 0x16b   :  { %2452 = vmatpush.bf16.msra.mxu0 %v3539_v56 }
 0x16e   :  { %v4641_v35 = vpop.f32.mrf.mxu1  ;;  %2408 = vmatpush.bf16.msra.mxu3 %v3526_v43 }
 0x16f   :  { %v4643_v7 = vpop.f32.mrf.mxu2  ;;  %2453 = vmatpush.bf16.msra.mxu0 %v3538_v31 }
 0x172   :  { %2409 = vmatpush.bf16.msra.mxu3 %v3525_v14  ;;  %v3421_v14 = vld [vmem:[#allocation2 + $0x80] sm:$0xf0] }
 0x173   :  { %2454 = vmatpush.bf16.msra.mxu0 %v3537_v50  ;;  %v2816_v50 = vor.u32 %v3412_v41, %v2815_v3 }
 0x174   :  { %2381 = vmatmul.bf16.gmra.mxu2 %v2956_v10  ;;  %v2909_v10 = vld [vmem:[#allocation2 + $0x104] sm:$0xf0] }
 0x176   :  { %2170 = vmatmul.bf16.gmra.mxu0 %v2832_v30  ;;  %v2876_v30 = vor.u32 %v3424_v32, %v2873_v36  ;;  %v3451_v36 = vld [vmem:[#allocation2 + $0x174] sm:$0xf] }
 0x177   :  { %v2137_v60 = vpop.f32.mrf.mxu1  ;;  %v2186_v33 = vpop.f32.mrf.mxu2  ;;  %2455 = vmatpush.bf16.msra.mxu0 %v3536_v63 }
 0x178   :  { %2229 = vmatmul.bf16.gmra.mxu3 %v2908_v6  ;;  %2322 = vmatmul.bf16.gmra.mxu1 %v2880_v22  ;;  %v2138_v54 = vadd.f32 %v4629_v25, %v2137_v60  ;;  %v2987_v6 = vld [vmem:[#allocation2 + $0x178] sm:$0xf]  ;;  %v3016_v22 = vor.u32 %v3464_v23, %v3015_v0  ;;  %v2823_v0 = vld [vmem:[#allocation2 + $0x20] sm:$0xf] }
 0x179   :  { %v2988_v49 = vor.u32 %v3456_v4, %v2987_v6  ;;  %v3544_v60 = vld [vmem:[#allocation3 + $0x218] sm:$0xff]  ;;  %v3413_v6 = vld [vmem:[#allocation2 + $0x40] sm:$0xf0] }
 0x17a   :  { %v4646_v9 = vadd.f32 %v2186_v33, %v2138_v54  ;;  %v3061_v33 = vld [vmem:[#allocation2 + $0x22c] sm:$0xf0]  ;;  %2504 = vmatpush.bf16.msra.mxu1 %v3544_v60  ;;  %v2981_v23 = vld [vmem:[#allocation2 + $0x194] sm:$0xf0]  ;;  %v2824_v60 = vor.u32 %v3413_v6, %v2823_v0 }
 0x17b   :  { %v3064_v54 = vor.u32 %v3470_v1, %v3061_v33  ;;  %v3533_v33 = vld [vmem:[#allocation3 + $0x1c0] sm:$0xff] }
 0x17e   :  { %2505 = vmatpush.bf16.msra.mxu1 %v3543_v53  ;;  %v3460_v53 = vld [vmem:[#allocation2 + $0x1bc] sm:$0xf] }
 0x17f   :  { %v4648_v26 = vpop.f32.mrf.mxu1  ;;  %v4650_v17 = vpop.f32.mrf.mxu2 }
 0x182   :  { %2506 = vmatpush.bf16.msra.mxu1 %v3542_v34 }
 0x184   :  { %2386 = vmatmul.bf16.gmra.mxu2 %v2992_v55  ;;  %v3541_v55 = vld [vmem:[#allocation3 + $0x200] sm:$0xff] }
 0x186   :  { %2263 = vmatmul.bf16.vlgmr.msrb.gmra.mxu0 %v2804_v39  ;;  %v2912_v39 = vor.u32 %v3433_v16, %v2909_v10  ;;  %2507 = vmatpush.bf16.msra.mxu1 %v3541_v55 }
 0x187   :  { %v2142_v27 = vpop.f32.mrf.mxu1  ;;  %v2191_v8 = vpop.f32.mrf.mxu2 }
 0x188   :  { %2234 = vmatmul.bf16.gmra.mxu3 %v2944_v18  ;;  %2327 = vmatmul.bf16.gmra.mxu1 %v2916_v44  ;;  %v2143_v48 = vadd.f32 %v4629_v25, %v2142_v27  ;;  %v3023_v44 = vld [vmem:[#allocation2 + $0x1c0] sm:$0xf]  ;;  %v3535_v27 = vld [vmem:[#allocation3 + $0x1d0] sm:$0xff] }
 0x189   :  { %v3024_v40 = vor.u32 %v3465_v46, %v3023_v44  ;;  %2456 = vmatpush.bf16.msra.mxu0 %v3535_v27  ;;  %v2859_v27 = vld [vmem:[#allocation2 + $0x68] sm:$0xf] }
 0x18a   :  { %v4653_v58 = vadd.f32 %v2191_v8, %v2143_v48 }
 0x18d   :  { %2457 = vmatpush.bf16.msra.mxu0 %v3534_v5 }
 0x18f   :  { %v4655_v56 = vpop.f32.mrf.mxu2  ;;  %v4657_v61 = vpop.f32.mrf.mxu1 }
 0x191   :  { %2458 = vmatpush.bf16.msra.mxu0 %v3533_v33 }
 0x194   :  { %2391 = vmatmul.bf16.gmra.mxu2 %v3028_v42 }
 0x196   :  { %2268 = vmatmul.bf16.gmra.mxu0 %v2840_v59  ;;  %v3474_v59 = vld [vmem:[#allocation2 + $0x228] sm:$0xf0] }
 0x197   :  { %v2196_v2 = vpop.f32.mrf.mxu2  ;;  %v3060_v37 = vor.u32 %v3474_v59, %v3059_v21  ;;  %v3053_v21 = vld [vmem:[#allocation2 + $0x224] sm:$0xf0] }
 0x198   :  { %2239 = vmatmul.bf16.gmra.mxu3 %v2980_v45  ;;  %2332 = vmatmul.bf16.gmra.mxu1 %v2952_v52 }
 0x19f   :  { %v4662_v8 = vpop.f32.mrf.mxu2 }
 0x1a4   :  { %2396 = vmatmul.bf16.gmra.mxu2 %v3064_v54 }
 0x1a6   :  { %2273 = vmatmul.bf16.gmra.mxu0 %v2876_v30 }
 0x1a7   :  { %v2201_v52 = vpop.f32.mrf.mxu2 }
 0x1a8   :  { %2244 = vmatmul.bf16.gmra.mxu3 %v3016_v22  ;;  %2337 = vmatmul.bf16.gmra.mxu1 %v2988_v49  ;;  %v2984_v22 = vor.u32 %v3451_v36, %v2981_v23  ;;  %v2851_v49 = vld [vmem:[#allocation2 + $0x60] sm:$0xf]  ;;  %v2923_v23 = vld [vmem:[#allocation2 + $0xf0] sm:$0xf]  ;;  %v3439_v36 = vld [vmem:[#allocation2 + $0x110] sm:$0xf0] }
 0x1a9   :  { %v2852_v63 = vor.u32 %v3421_v14, %v2851_v49 }
 0x1b5   :  { %v2147_v18 = vpop.f32.mrf.mxu1 }
 0x1b6   :  { %2278 = vmatmul.bf16.gmra.mxu0 %v2912_v39  ;;  %v2148_v31 = vadd.f32 %v4629_v25, %v2147_v18  ;;  %v3422_v18 = vld [vmem:[#allocation2 + $0x88] sm:$0xf0] }
 0x1b7   :  { %v2860_v55 = vor.u32 %v3422_v18, %v2859_v27  ;;  %v3440_v27 = vld [vmem:[#allocation2 + $0x118] sm:$0xf0] }
 0x1b8   :  { %2249 = vmatmul.bf16.gmra.mxu3 %v3052_v57  ;;  %v4660_v62 = vadd.f32 %v2196_v2, %v2148_v31  ;;  %2342 = vmatmul.bf16.gmra.mxu1 %v3024_v40  ;;  %v3020_v57 = vor.u32 %v3460_v53, %v3017_v13  ;;  %v3430_v31 = vld [vmem:[#allocation2 + $0xc8] sm:$0xf0]  ;;  %v3408_v53 = vld [vmem:[#allocation2 + $0x1c] sm:$0xf] }
 0x1b9   :  { %v2888_v34 = vor.u32 %v3430_v31, %v2887_v28  ;;  %v2817_v28 = vld [vmem:[#allocation2 + $0x3c] sm:$0xf0]  ;;  %v3448_v31 = vld [vmem:[#allocation2 + $0x158] sm:$0xf0] }
 0x1bd   :  { %v4664_v48 = vpop.f32.mrf.mxu1 }
 0x1c3   :  { %v2117_v29 = vpop.f32.mrf.mxu0 }
 0x1c4   :  { %v2118_v16 = vadd.f32 %v4629_v25, %v2117_v29 }
 0x1c5   :  { %v2152_v45 = vpop.f32.mrf.mxu1 }
 0x1c6   :  { %2283 = vmatmul.bf16.gmra.mxu0 %v2948_v24  ;;  %v2153_v20 = vadd.f32 %v4629_v25, %v2152_v45  ;;  %v2130_v45 = vadd.f32 %v4629_v25, %v4634_v38  ;;  %v2924_v38 = vor.u32 %v3439_v36, %v2923_v23  ;;  %v3449_v23 = vld [vmem:[#allocation2 + $0x160] sm:$0xf0] }
 0x1c8   :  { %2410 = vmatmul.bf16.vlgmr.msra.gmra.mxu3 %v2816_v50  ;;  %v4667_v12 = vadd.f32 %v2201_v52, %v2153_v20  ;;  %2347 = vmatmul.bf16.gmra.mxu1 %v3060_v37  ;;  %v2179_v50 = vadd.f32 %v4636_v47, %v2130_v45  ;;  %v2895_v37 = vld [vmem:[#allocation2 + $0xb0] sm:$0xf]  ;;  %v3556_v47 = vld [vmem:[%s4913_s5 + $0x38] sm:$0xff] }
 0x1c9   :  { %2641 = vmatpush.bf16.msra.mxu2 %v3556_v47 }
 0x1cb   :  { %v2215_v42 = vpop.f32.mrf.mxu3  ;;  %v2119_v43 = vpop.f32.mrf.mxu0 }
 0x1cc   :  { %v2120_v51 = vadd.f32 %v4629_v25, %v2119_v43  ;;  %v3469_v43 = vld [vmem:[#allocation2 + $0x204] sm:$0xf] }
 0x1cd   :  { %v4669_v32 = vpop.f32.mrf.mxu1  ;;  %v3056_v0 = vor.u32 %v3469_v43, %v3053_v21  ;;  %v3417_v43 = vld [vmem:[#allocation2 + $0x64] sm:$0xf] }
 0x1d3   :  { %v2217_v4 = vpop.f32.mrf.mxu3  ;;  %v2122_v30 = vpop.f32.mrf.mxu0 }
 0x1d4   :  { %v2123_v20 = vadd.f32 %v4629_v25, %v2122_v30 }
 0x1d5   :  { %v4671_v1 = vpop.f32.mrf.mxu1 }
 0x1d6   :  { %2288 = vmatmul.bf16.gmra.mxu0 %v2984_v22  ;;  %v3431_v22 = vld [vmem:[#allocation2 + $0xd0] sm:$0xf0] }
 0x1d8   :  { %2415 = vmatmul.bf16.gmra.mxu3 %v2852_v63  ;;  %2508 = vmatmul.bf16.vlgmr.msra.gmra.mxu1 %v2824_v60 }
 0x1db   :  { %v2220_v54 = vpop.f32.mrf.mxu3  ;;  %v2124_v10 = vpop.f32.mrf.mxu0 }
 0x1dc   :  { %v2125_v30 = vadd.f32 %v4629_v25, %v2124_v10  ;;  %v2931_v10 = vld [vmem:[#allocation2 + $0xf8] sm:$0xf] }
 0x1dd   :  { %v4673_v2 = vpop.f32.mrf.mxu1 }
 0x1e3   :  { %v2222_v46 = vpop.f32.mrf.mxu3  ;;  %v2166_v39 = vpop.f32.mrf.mxu0 }
 0x1e4   :  { %v2167_v44 = vadd.f32 %v2166_v39, %v2118_v16 }
 0x1e5   :  { %v4676_v40 = vpop.f32.mrf.mxu1 }
 0x1e6   :  { %2293 = vmatmul.bf16.gmra.mxu0 %v3020_v57  ;;  %v2216_v11 = vadd.f32 %v2215_v42, %v2167_v44 }
 0x1e8   :  { %2420 = vmatmul.bf16.gmra.mxu3 %v2888_v34  ;;  %2513 = vmatmul.bf16.gmra.mxu1 %v2860_v55  ;;  %v2820_v55 = vor.u32 %v3408_v53, %v2817_v28 }
 0x1eb   :  { %v2225_v29 = vpop.f32.mrf.mxu3  ;;  %v2168_v3 = vpop.f32.mrf.mxu0 }
 0x1ec   :  { %v4680_v41 = vadd.f32 %v2225_v29, %v4632_v19  ;;  %v2169_v59 = vadd.f32 %v2168_v3, %v2120_v51  ;;  %v2959_v51 = vld [vmem:[#allocation2 + $0x138] sm:$0xf] }
 0x1ed   :  { %v4682_v24 = vpop.f32.mrf.mxu1 }
 0x1ee   :  { %v2218_v52 = vadd.f32 %v2217_v4, %v2169_v59  ;;  %v2896_v4 = vor.u32 %v3431_v22, %v2895_v37  ;;  %v2967_v22 = vld [vmem:[#allocation2 + $0x140] sm:$0xf] }
 0x1f3   :  { %v2227_v5 = vpop.f32.mrf.mxu3  ;;  %v2171_v42 = vpop.f32.mrf.mxu0 }
 0x1f4   :  { %v4688_v19 = vadd.f32 %v2227_v5, %v2179_v50  ;;  %v2172_v14 = vadd.f32 %v2171_v42, %v2123_v20  ;;  %v2853_v20 = vld [vmem:[#allocation2 + $0x84] sm:$0xf0]  ;;  %v2995_v42 = vld [vmem:[#allocation2 + $0x180] sm:$0xf] }
 0x1f5   :  { %v4690_v6 = vpop.f32.mrf.mxu1 }
 0x1f6   :  { %2298 = vmatmul.bf16.gmra.mxu0 %v3056_v0  ;;  %v2221_v49 = vadd.f32 %v2220_v54, %v2172_v14  ;;  %v2135_v54 = vadd.f32 %v4629_v25, %v4641_v35  ;;  %v2960_v35 = vor.u32 %v3448_v31, %v2959_v51  ;;  %v2856_v14 = vor.u32 %v3417_v43, %v2853_v20  ;;  %v3457_v0 = vld [vmem:[#allocation2 + $0x1a0] sm:$0xf0]  ;;  %v3039_v43 = vld [vmem:[#allocation2 + $0x1d0] sm:$0xf] }
 0x1f8   :  { %2425 = vmatmul.bf16.gmra.mxu3 %v2924_v38  ;;  %2518 = vmatmul.bf16.gmra.mxu1 %v2896_v4  ;;  %v2184_v18 = vadd.f32 %v4643_v7, %v2135_v54  ;;  %v3555_v7 = vld [vmem:[%s4913_s5 + $0x30] sm:$0xff]  ;;  %v3554_v4 = vld [vmem:[%s4913_s5 + $0x28] sm:$0xff] }
 0x1f9   :  { %2642 = vmatpush.bf16.msra.mxu2 %v3555_v7  ;;  %v2889_v54 = vld [vmem:[#allocation2 + $0xcc] sm:$0xf0] }
 0x1fb   :  { %v2230_v63 = vpop.f32.mrf.mxu3  ;;  %v2173_v60 = vpop.f32.mrf.mxu0 }
 0x1fc   :  { %v4697_v33 = vadd.f32 %v2230_v63, %v4639_v15  ;;  %v2174_v13 = vadd.f32 %v2173_v60, %v2125_v30 }
 0x1fd   :  { %v4699_v16 = vpop.f32.mrf.mxu1  ;;  %2643 = vmatpush.bf16.msra.mxu2 %v3554_v4 }
 0x1fe   :  { %v2223_v39 = vadd.f32 %v2222_v46, %v2174_v13  ;;  %v2932_v46 = vor.u32 %v3440_v27, %v2931_v10  ;;  %v3426_v13 = vld [vmem:[#allocation2 + $0xac] sm:$0xf] }
 0x1ff   :  { %v2892_v10 = vor.u32 %v3426_v13, %v2889_v54  ;;  %v3458_v27 = vld [vmem:[#allocation2 + $0x1a8] sm:$0xf0]  ;;  %v2961_v13 = vld [vmem:[#allocation2 + $0x15c] sm:$0xf0] }
 0x203   :  { %v2232_v44 = vpop.f32.mrf.mxu3  ;;  %v2264_v57 = vpop.f32.mrf.mxu0 }
 0x204   :  { %v4704_v34 = vadd.f32 %v2232_v44, %v2184_v18  ;;  %v2265_v15 = vadd.f32 %v2264_v57, %v2216_v11  ;;  %v3031_v18 = vld [vmem:[#allocation2 + $0x1c8] sm:$0xf]  ;;  %v3466_v44 = vld [vmem:[#allocation2 + $0x1e8] sm:$0xf0] }
 0x205   :  { %v4706_v29 = vpop.f32.mrf.mxu1  ;;  %v3003_v57 = vld [vmem:[#allocation2 + $0x188] sm:$0xf] }
 0x206   :  { %v4709_v3 = vadd.f32 %v4671_v1, %v2265_v15  ;;  %2459 = vmatmul.bf16.vlgmr.msra.gmra.mxu0 %v2820_v55  ;;  %v3553_v15 = vld [vmem:[%s4913_s5 + $0x20] sm:$0xff] }
 0x207   :  { %2644 = vmatpush.bf16.msra.mxu2 %v3553_v15 }
 0x208   :  { %2430 = vmatmul.bf16.gmra.mxu3 %v2960_v35  ;;  %2523 = vmatmul.bf16.gmra.mxu1 %v2932_v46  ;;  %v2150_v46 = vadd.f32 %v4629_v25, %v4664_v48 }
 0x20b   :  { %v2235_v59 = vpop.f32.mrf.mxu3  ;;  %v2266_v45 = vpop.f32.mrf.mxu0 }
 0x20c   :  { %v4715_v11 = vadd.f32 %v2235_v59, %v4646_v9  ;;  %v2267_v21 = vadd.f32 %v2266_v45, %v2218_v52  ;;  %v2996_v52 = vor.u32 %v3457_v0, %v2995_v42  ;;  %v3435_v59 = vld [vmem:[#allocation2 + $0xf4] sm:$0xf]  ;;  %v2925_v45 = vld [vmem:[#allocation2 + $0x114] sm:$0xf0]  ;;  %v3067_v0 = vld [vmem:[#allocation2 + $0x210] sm:$0xf] }
 0x20d   :  { %v4717_v50 = vpop.f32.mrf.mxu1  ;;  %v3475_v42 = vld [vmem:[#allocation2 + $0x230] sm:$0xf0] }
 0x20e   :  { %v4720_v1 = vadd.f32 %v4673_v2, %v2267_v21  ;;  %v2968_v2 = vor.u32 %v3449_v23, %v2967_v22  ;;  %v2199_v21 = vadd.f32 %v4662_v8, %v2150_v46  ;;  %v3467_v23 = vld [vmem:[#allocation2 + $0x1f0] sm:$0xf0]  ;;  %v3552_v8 = vld [vmem:[%s4913_s5 + $0x18] sm:$0xff] }
 0x20f   :  { %v3040_v22 = vor.u32 %v3467_v23, %v3039_v43  ;;  %2645 = vmatpush.bf16.msra.mxu2 %v3552_v8 }
 0x213   :  { %v4722_v37 = vpop.f32.mrf.mxu3  ;;  %v2269_v5 = vpop.f32.mrf.mxu0 }
 0x214   :  { %v2270_v36 = vadd.f32 %v2269_v5, %v2221_v49 }
 0x215   :  { %v4727_v38 = vpop.f32.mrf.mxu1 }
 0x216   :  { %v4725_v9 = vadd.f32 %v4676_v40, %v2270_v36  ;;  %2464 = vmatmul.bf16.gmra.mxu0 %v2856_v14 }
 0x218   :  { %2435 = vmatmul.bf16.gmra.mxu3 %v2996_v52  ;;  %2528 = vmatmul.bf16.gmra.mxu1 %v2968_v2 }
 0x21b   :  { %v2240_v47 = vpop.f32.mrf.mxu3  ;;  %v2271_v49 = vpop.f32.mrf.mxu0 }
 0x21c   :  { %v4733_v30 = vadd.f32 %v2240_v47, %v4653_v58  ;;  %v2272_v63 = vadd.f32 %v2271_v49, %v2223_v39  ;;  %v3032_v39 = vor.u32 %v3466_v44, %v3031_v18  ;;  %v2203_v49 = vpop.f32.mrf.mxu2  ;;  %v3444_v44 = vld [vmem:[#allocation2 + $0x13c] sm:$0xf] }
 0x21d   :  { %v4738_v60 = vpop.f32.mrf.mxu1 }
 0x21e   :  { %v4736_v40 = vadd.f32 %v4682_v24, %v2272_v63  ;;  %v3004_v24 = vor.u32 %v3458_v27, %v3003_v57  ;;  %v3476_v57 = vld [vmem:[#allocation2 + $0x238] sm:$0xf0]  ;;  %v3075_v27 = vld [vmem:[#allocation2 + $0x218] sm:$0xf] }
 0x223   :  { %v4740_v53 = vpop.f32.mrf.mxu3  ;;  %v2274_v28 = vpop.f32.mrf.mxu0 }
 0x224   :  { %v2275_v31 = vadd.f32 %v2274_v28, %v4680_v41 }
 0x225   :  { %v4749_v55 = vpop.f32.mrf.mxu1 }
 0x226   :  { %v4744_v58 = vadd.f32 %v4690_v6, %v2275_v31  ;;  %2469 = vmatmul.bf16.gmra.mxu0 %v2892_v10  ;;  %v2964_v10 = vor.u32 %v3444_v44, %v2961_v13  ;;  %v3471_v13 = vld [vmem:[#allocation2 + $0x214] sm:$0xf] }
 0x228   :  { %2440 = vmatmul.bf16.gmra.mxu3 %v3032_v39  ;;  %2533 = vmatmul.bf16.gmra.mxu1 %v3004_v24  ;;  %v3551_v39 = vld [vmem:[%s4913_s5 + $0x10] sm:$0xff] }
 0x229   :  { %2646 = vmatpush.bf16.msra.mxu2 %v3551_v39 }
 0x22b   :  { %v2245_v51 = vpop.f32.mrf.mxu3  ;;  %v2276_v35 = vpop.f32.mrf.mxu0 }
 0x22c   :  { %v4752_v41 = vadd.f32 %v2245_v51, %v4660_v62  ;;  %v2277_v6 = vadd.f32 %v2276_v35, %v4688_v19  ;;  %v2928_v19 = vor.u32 %v3435_v59, %v2925_v45  ;;  %v2997_v59 = vld [vmem:[#allocation2 + $0x1a4] sm:$0xf0]  ;;  %v2145_v45 = vadd.f32 %v4629_v25, %v4657_v61  ;;  %v2362_v61 = vpop.f32.mrf.mxu2 }
 0x22d   :  { %v2340_v14 = vpop.f32.mrf.mxu1  ;;  %v2363_v39 = vadd.f32 %v2362_v61, %v4709_v3 }
 0x22e   :  { %v4758_v7 = vadd.f32 %v4699_v16, %v2277_v6  ;;  %v3068_v16 = vor.u32 %v3475_v42, %v3067_v0 }
 0x233   :  { %v2247_v20 = vpop.f32.mrf.mxu3  ;;  %v2279_v5 = vpop.f32.mrf.mxu0 }
 0x234   :  { %v4761_v36 = vadd.f32 %v2247_v20, %v2199_v21  ;;  %v2280_v62 = vadd.f32 %v2279_v5, %v4697_v33  ;;  %v2364_v8 = vpop.f32.mrf.mxu2 }
 0x235   :  { %v2343_v63 = vpop.f32.mrf.mxu1 }
 0x236   :  { %v4765_v48 = vadd.f32 %v4706_v29, %v2280_v62  ;;  %2474 = vmatmul.bf16.gmra.mxu0 %v2928_v19  ;;  %v2155_v29 = vadd.f32 %v4629_v25, %v4669_v32  ;;  %v3462_v62 = vld [vmem:[#allocation2 + $0x1cc] sm:$0xf] }
 0x238   :  { %2445 = vmatmul.bf16.gmra.mxu3 %v3068_v16  ;;  %2538 = vmatmul.bf16.gmra.mxu1 %v3040_v22  ;;  %v2204_v54 = vadd.f32 %v2203_v49, %v2155_v29  ;;  %v3069_v49 = vld [vmem:[#allocation2 + $0x234] sm:$0xf0] }
 0x23b   :  { %v2250_v52 = vpop.f32.mrf.mxu3  ;;  %v2281_v2 = vpop.f32.mrf.mxu0 }
 0x23c   :  { %v4771_v33 = vadd.f32 %v2250_v52, %v4667_v12  ;;  %v2282_v4 = vadd.f32 %v2281_v2, %v4704_v34  ;;  %v2140_v12 = vadd.f32 %v4629_v25, %v4648_v26 }
 0x23d   :  { %v2345_v15 = vpop.f32.mrf.mxu1 }
 0x23e   :  { %v4777_v47 = vadd.f32 %v4717_v50, %v2282_v4  ;;  %v3076_v50 = vor.u32 %v3476_v57, %v3075_v27  ;;  %v2189_v24 = vadd.f32 %v4650_v17, %v2140_v12 }
 0x240   :  { %v2238_v26 = vadd.f32 %v4722_v37, %v2189_v24  ;;  %v3550_v37 = vld [vmem:[%s4913_s5 + $0x8] sm:$0xff] }
 0x241   :  { %2647 = vmatpush.bf16.msra.mxu2 %v3550_v37 }
 0x243   :  { %v2252_v28 = vpop.f32.mrf.mxu3  ;;  %v2284_v18 = vpop.f32.mrf.mxu0 }
 0x244   :  { %v2253_v31 = vadd.f32 %v2252_v28, %v2204_v54  ;;  %v2285_v34 = vadd.f32 %v2284_v18, %v4715_v11  ;;  %v3072_v28 = vor.u32 %v3471_v13, %v3069_v49 }
 0x245   :  { %v2348_v6 = vpop.f32.mrf.mxu1 }
 0x246   :  { %v4783_v32 = vadd.f32 %v4727_v38, %v2285_v34  ;;  %2479 = vmatmul.bf16.gmra.mxu0 %v2964_v10  ;;  %v3453_v38 = vld [vmem:[#allocation2 + $0x184] sm:$0xf] }
 0x247   :  { %v3000_v17 = vor.u32 %v3453_v38, %v2997_v59 }
 0x248   :  { %2543 = vmatmul.bf16.gmra.mxu1 %v3076_v50 }
 0x24b   :  { %v2286_v51 = vpop.f32.mrf.mxu0 }
 0x24c   :  { %v2287_v11 = vadd.f32 %v2286_v51, %v2238_v26 }
 0x24d   :  { %v2350_v23 = vpop.f32.mrf.mxu1 }
 0x24e   :  { %v4791_v35 = vadd.f32 %v4738_v60, %v2287_v11  ;;  %v2194_v60 = vadd.f32 %v4655_v56, %v2145_v45 }
 0x250   :  { %v2243_v5 = vadd.f32 %v4740_v53, %v2194_v60  ;;  %v3549_v53 = vld [vmem:[%s4913_s5] sm:$0xff] }
 0x251   :  { %2648 = vmatpush.bf16.msra.mxu2 %v3549_v53 }
 0x253   :  { %v2289_v46 = vpop.f32.mrf.mxu0 }
 0x254   :  { %v2290_v21 = vadd.f32 %v2289_v46, %v4733_v30  ;;  %v2411_v30 = vpop.f32.mrf.mxu3 }
 0x255   :  { %v2509_v56 = vpop.f32.mrf.mxu1 }
 0x256   :  { %v4797_v20 = vadd.f32 %v4749_v55, %v2290_v21  ;;  %2484 = vmatmul.bf16.gmra.mxu0 %v3000_v17  ;;  %v3033_v55 = vld [vmem:[#allocation2 + $0x1ec] sm:$0xf0] }
 0x257   :  { %v3036_v16 = vor.u32 %v3462_v62, %v3033_v55 }
 0x25b   :  { %v2291_v42 = vpop.f32.mrf.mxu0 }
 0x25c   :  { %v2292_v43 = vadd.f32 %v2291_v42, %v2243_v5 }
 0x25d   :  { %v2511_v29 = vpop.f32.mrf.mxu1 }
 0x25e   :  { %v4804_v25 = vadd.f32 %v2340_v14, %v2292_v43  ;;  %v2413_v14 = vpop.f32.mrf.mxu3 }
 0x263   :  { %v2294_v19 = vpop.f32.mrf.mxu0 }
 0x264   :  { %v2295_v0 = vadd.f32 %v2294_v19, %v4752_v41 }
 0x265   :  { %v2514_v57 = vpop.f32.mrf.mxu1 }
 0x266   :  { %v4807_v22 = vadd.f32 %v2343_v63, %v2295_v0  ;;  %2489 = vmatmul.bf16.gmra.mxu0 %v3036_v16  ;;  %v2367_v63 = vpop.f32.mrf.mxu2  ;;  %v2416_v18 = vpop.f32.mrf.mxu3 }
 0x267   :  { %v2368_v3 = vadd.f32 %v2367_v63, %v4725_v9 }
 0x269   :  { %v2417_v43 = vadd.f32 %v2416_v18, %v2368_v3 }
 0x26b   :  { %v2296_v52 = vpop.f32.mrf.mxu0 }
 0x26c   :  { %v2297_v2 = vadd.f32 %v2296_v52, %v4761_v36 }
 0x26d   :  { %v2516_v24 = vpop.f32.mrf.mxu1 }
 0x26e   :  { %v4813_v4 = vadd.f32 %v2345_v15, %v2297_v2  ;;  %v2369_v10 = vpop.f32.mrf.mxu2  ;;  %v2418_v36 = vpop.f32.mrf.mxu3  ;;  %v2412_v15 = vadd.f32 %v2411_v30, %v2363_v39 }
 0x273   :  { %v2299_v41 = vpop.f32.mrf.mxu0 }
 0x274   :  { %v2300_v54 = vadd.f32 %v2299_v41, %v4771_v33  ;;  %v2365_v33 = vadd.f32 %v2364_v8, %v4720_v1  ;;  %v2370_v1 = vadd.f32 %v2369_v10, %v4736_v40 }
 0x276   :  { %v4816_v44 = vadd.f32 %v2348_v6, %v2300_v54  ;;  %2494 = vmatmul.bf16.gmra.mxu0 %v3072_v28  ;;  %v2372_v26 = vpop.f32.mrf.mxu2  ;;  %v2421_v11 = vpop.f32.mrf.mxu3  ;;  %v2414_v38 = vadd.f32 %v2413_v14, %v2365_v33  ;;  %v2419_v30 = vadd.f32 %v2418_v36, %v2370_v1 }
 0x277   :  { %v2373_v9 = vadd.f32 %v2372_v26, %v4744_v58 }
 0x279   :  { %v2422_v49 = vadd.f32 %v2421_v11, %v2373_v9 }
 0x27b   :  { %v2301_v12 = vpop.f32.mrf.mxu0 }
 0x27c   :  { %v2302_v34 = vadd.f32 %v2301_v12, %v2253_v31  ;;  %v2519_v31 = vpop.f32.mrf.mxu1 }
 0x27e   :  { %v4818_v27 = vadd.f32 %v2350_v23, %v2302_v34  ;;  %v2374_v37 = vpop.f32.mrf.mxu2  ;;  %v2423_v5 = vpop.f32.mrf.mxu3 }
 0x27f   :  { %v2375_v41 = vadd.f32 %v2374_v37, %v4758_v7 }
 0x281   :  { %v2424_v63 = vadd.f32 %v2423_v5, %v2375_v41 }
 0x283   :  { %v2460_v50 = vpop.f32.mrf.mxu0 }
 0x284   :  { %v2461_v51 = vadd.f32 %v2460_v50, %v2412_v15  ;;  %v2521_v61 = vpop.f32.mrf.mxu1 }
 0x286   :  { %v2510_v46 = vadd.f32 %v2509_v56, %v2461_v51  ;;  %v2377_v55 = vpop.f32.mrf.mxu2  ;;  %v2426_v16 = vpop.f32.mrf.mxu3 }
 0x287   :  { %v2378_v58 = vadd.f32 %v2377_v55, %v4765_v48 }
 0x288   :  { %v2549_v21 = vmax.f32 %v2510_v46, 0.0 }
 0x289   :  { %v2427_v15 = vadd.f32 %v2426_v16, %v2378_v58 }
 0x28b   :  { %v2462_v6 = vpop.f32.mrf.mxu0 }
 0x28c   :  { %v2463_v59 = vadd.f32 %v2462_v6, %v2414_v38  ;;  %v2524_v52 = vpop.f32.mrf.mxu1 }
 0x28e   :  { %v2512_v45 = vadd.f32 %v2511_v29, %v2463_v59  ;;  %v2379_v29 = vpop.f32.mrf.mxu2  ;;  %v2428_v40 = vpop.f32.mrf.mxu3 }
 0x28f   :  { %v2380_v7 = vadd.f32 %v2379_v29, %v4777_v47 }
 0x290   :  { %v2550_v17 = vmax.f32 %v2512_v45, 0.0 }
 0x291   :  { %v2429_v11 = vadd.f32 %v2428_v40, %v2380_v7 }
 0x292   :  { %v2565_v60 = vpack.c.bf16 %v2550_v17, %v2549_v21 }
 0x293   :  { %v2465_v42 = vpop.f32.mrf.mxu0 }
 0x294   :  { %2649 = vmatmul.bf16.vlgmr.msra.gmra.mxu2 %v2565_v60  ;;  %v2466_v23 = vadd.f32 %v2465_v42, %v2417_v43 }
 0x296   :  { %v2515_v19 = vadd.f32 %v2514_v57, %v2466_v23  ;;  %v2526_v57 = vpop.f32.mrf.mxu1  ;;  %v2382_v34 = vpop.f32.mrf.mxu2 }
 0x297   :  { %v2431_v50 = vpop.f32.mrf.mxu3  ;;  %v2383_v48 = vadd.f32 %v2382_v34, %v4783_v32 }
 0x298   :  { %v2551_v53 = vmax.f32 %v2515_v19, 0.0 }
 0x299   :  { %v2432_v3 = vadd.f32 %v2431_v50, %v2383_v48 }
 0x29b   :  { %v2467_v62 = vpop.f32.mrf.mxu0 }
 0x29c   :  { %v2468_v0 = vadd.f32 %v2467_v62, %v2419_v30 }
 0x29e   :  { %v2517_v56 = vadd.f32 %v2516_v24, %v2468_v0  ;;  %v2529_v26 = vpop.f32.mrf.mxu1  ;;  %v2384_v51 = vpop.f32.mrf.mxu2 }
 0x29f   :  { %v2433_v38 = vpop.f32.mrf.mxu3  ;;  %v2385_v47 = vadd.f32 %v2384_v51, %v4791_v35 }
 0x2a0   :  { %v2552_v8 = vmax.f32 %v2517_v56, 0.0 }
 0x2a1   :  { %v2434_v1 = vadd.f32 %v2433_v38, %v2385_v47 }
 0x2a2   :  { %v2566_v14 = vpack.c.bf16 %v2552_v8, %v2551_v53 }
 0x2a3   :  { %v2470_v2 = vpop.f32.mrf.mxu0 }
 0x2a4   :  { %2654 = vmatmul.bf16.gmra.mxu2 %v2566_v14  ;;  %v2471_v13 = vadd.f32 %v2470_v2, %v2422_v49 }
 0x2a6   :  { %v2520_v28 = vadd.f32 %v2519_v31, %v2471_v13  ;;  %v2531_v17 = vpop.f32.mrf.mxu1  ;;  %v2387_v5 = vpop.f32.mrf.mxu2 }
 0x2a7   :  { %v2436_v42 = vpop.f32.mrf.mxu3  ;;  %v2388_v32 = vadd.f32 %v2387_v5, %v4797_v20 }
 0x2a8   :  { %v2553_v10 = vmax.f32 %v2520_v28, 0.0 }
 0x2ab   :  { %v2472_v54 = vpop.f32.mrf.mxu0 }
 0x2ac   :  { %v2473_v18 = vadd.f32 %v2472_v54, %v2424_v63 }
 0x2ae   :  { %v2522_v12 = vadd.f32 %v2521_v61, %v2473_v18  ;;  %v2534_v23 = vpop.f32.mrf.mxu1  ;;  %v2389_v55 = vpop.f32.mrf.mxu2 }
 0x2af   :  { %v2438_v0 = vpop.f32.mrf.mxu3  ;;  %v2390_v35 = vadd.f32 %v2389_v55, %v4804_v25 }
 0x2b0   :  { %v2554_v36 = vmax.f32 %v2522_v12, 0.0 }
 0x2b1   :  { %v2439_v49 = vadd.f32 %v2438_v0, %v2390_v35  ;;  %v3595_v0 = vld [vmem:[%s4908_s0 + $0x8] sm:$0xff] }
 0x2b2   :  { %v2567_v39 = vpack.c.bf16 %v2554_v36, %v2553_v10 }
 0x2b3   :  { %v2475_v24 = vpop.f32.mrf.mxu0 }
 0x2b4   :  { %2659 = vmatmul.bf16.gmra.mxu2 %v2567_v39  ;;  %v2476_v33 = vadd.f32 %v2475_v24, %v2427_v15 }
 0x2b6   :  { %v2525_v46 = vadd.f32 %v2524_v52, %v2476_v33  ;;  %v2536_v14 = vpop.f32.mrf.mxu1  ;;  %v2437_v52 = vadd.f32 %v2436_v42, %v2388_v32  ;;  %v2392_v2 = vpop.f32.mrf.mxu2  ;;  %v3596_v32 = vld [vmem:[%s4908_s0 + $0x10] sm:$0xff] }
 0x2b7   :  { %v2441_v29 = vpop.f32.mrf.mxu3  ;;  %v2393_v10 = vadd.f32 %v2392_v2, %v4807_v22 }
 0x2b8   :  { %v2555_v31 = vmax.f32 %v2525_v46, 0.0 }
 0x2b9   :  { %v2442_v36 = vadd.f32 %v2441_v29, %v2393_v10 }
 0x2bb   :  { %v2477_v6 = vpop.f32.mrf.mxu0 }
 0x2bc   :  { %v2478_v59 = vadd.f32 %v2477_v6, %v2429_v11 }
 0x2be   :  { %v2527_v45 = vadd.f32 %v2526_v57, %v2478_v59  ;;  %v2539_v54 = vpop.f32.mrf.mxu1  ;;  %v2394_v57 = vpop.f32.mrf.mxu2 }
 0x2bf   :  { %v2443_v34 = vpop.f32.mrf.mxu3  ;;  %v2395_v25 = vadd.f32 %v2394_v57, %v4813_v4  ;;  %v3599_v57 = vld [vmem:[%s4908_s0 + $0x28] sm:$0xff] }
 0x2c0   :  { %v2556_v21 = vmax.f32 %v2527_v45, 0.0 }
 0x2c1   :  { %v2444_v24 = vadd.f32 %v2443_v34, %v2395_v25 }
 0x2c2   :  { %v2568_v37 = vpack.c.bf16 %v2556_v21, %v2555_v31 }
 0x2c3   :  { %v2480_v60 = vpop.f32.mrf.mxu0 }
 0x2c4   :  { %2664 = vmatmul.bf16.gmra.mxu2 %v2568_v37  ;;  %v2481_v43 = vadd.f32 %v2480_v60, %v2432_v3 }
 0x2c6   :  { %v2530_v30 = vadd.f32 %v2529_v26, %v2481_v43  ;;  %v2541_v39 = vpop.f32.mrf.mxu1  ;;  %v2397_v7 = vpop.f32.mrf.mxu2 }
 0x2c7   :  { %v2446_v33 = vpop.f32.mrf.mxu3  ;;  %v2398_v22 = vadd.f32 %v2397_v7, %v4816_v44  ;;  %v4839_v44 = vld [vmem:[%s4914_s6] ss:$0 sm:$0xff] }
 0x2c8   :  { %v2557_v16 = vmax.f32 %v2530_v30, 0.0 }
 0x2c9   :  { %v2447_v45 = vadd.f32 %v2446_v33, %v2398_v22 }
 0x2cb   :  { %v2482_v61 = vpop.f32.mrf.mxu0 }
 0x2cc   :  { %v2483_v62 = vadd.f32 %v2482_v61, %v2434_v1 }
 0x2ce   :  { %v2532_v19 = vadd.f32 %v2531_v17, %v2483_v62  ;;  %v2544_v46 = vpop.f32.mrf.mxu1  ;;  %v2399_v31 = vpop.f32.mrf.mxu2 }
 0x2cf   :  { %v2448_v4 = vpop.f32.mrf.mxu3  ;;  %v2400_v21 = vadd.f32 %v2399_v31, %v4818_v27  ;;  %v3594_v27 = vld [vmem:[%s4908_s0] sm:$0xff] }
 0x2d0   :  { %v2558_v56 = vmax.f32 %v2532_v19, 0.0 }
 0x2d1   :  { %v2449_v37 = vadd.f32 %v2448_v4, %v2400_v21  ;;  %v3604_v21 = vld [vmem:[%s4908_s0 + $0x50] sm:$0xff] }
 0x2d2   :  { %v2569_v53 = vpack.c.bf16 %v2558_v56, %v2557_v16 }
 0x2d3   :  { %v2485_v8 = vpop.f32.mrf.mxu0 }
 0x2d4   :  { %2669 = vmatmul.bf16.gmra.mxu2 %v2569_v53  ;;  %v2486_v9 = vadd.f32 %v2485_v8, %v2437_v52 }
 0x2d6   :  { %v2535_v41 = vadd.f32 %v2534_v23, %v2486_v9  ;;  %v2546_v42 = vpop.f32.mrf.mxu1  ;;  %v3597_v9 = vld [vmem:[%s4908_s0 + $0x18] sm:$0xff] }
 0x2d8   :  { %v2559_v28 = vmax.f32 %v2535_v41, 0.0 }
 0x2db   :  { %v2487_v40 = vpop.f32.mrf.mxu0 }
 0x2dc   :  { %v2488_v13 = vadd.f32 %v2487_v40, %v2439_v49 }
 0x2de   :  { %v2537_v63 = vadd.f32 %v2536_v14, %v2488_v13  ;;  %v3598_v13 = vld [vmem:[%s4908_s0 + $0x20] sm:$0xff] }
 0x2e0   :  { %v2560_v18 = vmax.f32 %v2537_v63, 0.0 }
 0x2e2   :  { %v2570_v12 = vpack.c.bf16 %v2560_v18, %v2559_v28 }
 0x2e3   :  { %v2490_v20 = vpop.f32.mrf.mxu0 }
 0x2e4   :  { %2674 = vmatmul.bf16.gmra.mxu2 %v2570_v12  ;;  %v2491_v50 = vadd.f32 %v2490_v20, %v2442_v36  ;;  %v3600_v36 = vld [vmem:[%s4908_s0 + $0x30] sm:$0xff] }
 0x2e6   :  { %v2540_v15 = vadd.f32 %v2539_v54, %v2491_v50 }
 0x2e8   :  { %v2561_v11 = vmax.f32 %v2540_v15, 0.0 }
 0x2eb   :  { %v2492_v58 = vpop.f32.mrf.mxu0 }
 0x2ec   :  { %v2493_v26 = vadd.f32 %v2492_v58, %v2444_v24  ;;  %v3601_v58 = vld [vmem:[%s4908_s0 + $0x38] sm:$0xff] }
 0x2ee   :  { %v2542_v51 = vadd.f32 %v2541_v39, %v2493_v26 }
 0x2f0   :  { %v2562_v38 = vmax.f32 %v2542_v51, 0.0  ;;  %v3602_v51 = vld [vmem:[%s4908_s0 + $0x40] sm:$0xff] }
 0x2f2   :  { %v2571_v6 = vpack.c.bf16 %v2562_v38, %v2561_v11 }
 0x2f3   :  { %v2495_v59 = vpop.f32.mrf.mxu0 }
 0x2f4   :  { %2679 = vmatmul.bf16.gmra.mxu2 %v2571_v6  ;;  %v2496_v17 = vadd.f32 %v2495_v59, %v2447_v45  ;;  %v3603_v59 = vld [vmem:[%s4908_s0 + $0x48] sm:$0xff] }
 0x2f6   :  { %v2545_v5 = vadd.f32 %v2544_v46, %v2496_v17 }
 0x2f8   :  { %v2563_v47 = vmax.f32 %v2545_v5, 0.0 }
 0x2fb   :  { %v2497_v60 = vpop.f32.mrf.mxu0 }
 0x2fc   :  { %v2498_v48 = vadd.f32 %v2497_v60, %v2449_v37 }
 0x2fe   :  { %v2547_v3 = vadd.f32 %v2546_v42, %v2498_v48  ;;  %v3605_v48 = vld [vmem:[%s4908_s0 + $0x58] sm:$0xff] }
 0x300   :  { %v2564_v43 = vmax.f32 %v2547_v3, 0.0 }
 0x302   :  { %v2572_v1 = vpack.c.bf16 %v2564_v43, %v2563_v47 }
 0x304   :  { %2684 = vmatmul.bf16.gmra.mxu2 %v2572_v1  ;;  %v3606_v1 = vld [vmem:[%s4908_s0 + $0x60] sm:$0xff] }
 0x317   :  { %v2650_v23 = vpop.f32.mrf.mxu2 }
 0x318   :  { %v2651_v61 = vadd.f32 %v4839_v44, %v2650_v23 }
 0x31a   :  { %v2690_v30 = vadd.f32 %v3594_v27, %v2651_v61 }
 0x31c   :  { %v2706_v62 = vmax.f32 %v2690_v30, 0.0 }
 0x31e   :  { %2722 = vst [vmem:[#allocation6] sm:$0xff] %v2706_v62  ;;  %v3607_v62 = vld [vmem:[%s4908_s0 + $0x68] sm:$0xff] }
 0x31f   :  { %v2652_v55 = vpop.f32.mrf.mxu2 }
 0x320   :  { %v2653_v19 = vadd.f32 %v4839_v44, %v2652_v55 }
 0x322   :  { %v2691_v16 = vadd.f32 %v3595_v0, %v2653_v19 }
 0x324   :  { %v2707_v56 = vmax.f32 %v2691_v16, 0.0 }
 0x326   :  { %2723 = vst [vmem:[#allocation6 + $0x8] sm:$0xff] %v2707_v56  ;;  %v3608_v56 = vld [vmem:[%s4908_s0 + $0x70] sm:$0xff] }
 0x327   :  { %v2655_v53 = vpop.f32.mrf.mxu2 }
 0x328   :  { %v2656_v8 = vadd.f32 %v4839_v44, %v2655_v53 }
 0x32a   :  { %v2692_v14 = vadd.f32 %v3596_v32, %v2656_v8 }
 0x32c   :  { %v2708_v52 = vmax.f32 %v2692_v14, 0.0 }
 0x32e   :  { %2724 = vst [vmem:[#allocation6 + $0x10] sm:$0xff] %v2708_v52  ;;  %v3609_v52 = vld [vmem:[%s4908_s0 + $0x78] sm:$0xff] }
 0x32f   :  { %v2657_v2 = vpop.f32.mrf.mxu2 }
 0x330   :  { %v2658_v35 = vadd.f32 %v4839_v44, %v2657_v2 }
 0x332   :  { %v2693_v29 = vadd.f32 %v3597_v9, %v2658_v35 }
 0x334   :  { %v2709_v49 = vmax.f32 %v2693_v29, 0.0 }
 0x336   :  { %2725 = vst [vmem:[#allocation6 + $0x18] sm:$0xff] %v2709_v49 }
 0x337   :  { %v2660_v40 = vpop.f32.mrf.mxu2 }
 0x338   :  { %v2661_v41 = vadd.f32 %v4839_v44, %v2660_v40 }
 0x33a   :  { %v2694_v63 = vadd.f32 %v3598_v13, %v2661_v41 }
 0x33c   :  { %v2710_v54 = vmax.f32 %v2694_v63, 0.0 }
 0x33e   :  { %2726 = vst [vmem:[#allocation6 + $0x20] sm:$0xff] %v2710_v54 }
 0x33f   :  { %v2662_v28 = vpop.f32.mrf.mxu2 }
 0x340   :  { %v2663_v18 = vadd.f32 %v4839_v44, %v2662_v28 }
 0x342   :  { %v2695_v12 = vadd.f32 %v3599_v57, %v2663_v18 }
 0x344   :  { %v2711_v34 = vmax.f32 %v2695_v12, 0.0 }
 0x346   :  { %2727 = vst [vmem:[#allocation6 + $0x28] sm:$0xff] %v2711_v34 }
 0x347   :  { %v2665_v20 = vpop.f32.mrf.mxu2 }
 0x348   :  { %v2666_v10 = vadd.f32 %v4839_v44, %v2665_v20 }
 0x34a   :  { %v2696_v25 = vadd.f32 %v3600_v36, %v2666_v10 }
 0x34c   :  { %v2712_v50 = vmax.f32 %v2696_v25, 0.0 }
 0x34e   :  { %2728 = vst [vmem:[#allocation6 + $0x30] sm:$0xff] %v2712_v50 }
 0x34f   :  { %v2667_v39 = vpop.f32.mrf.mxu2 }
 0x350   :  { %v2668_v24 = vadd.f32 %v4839_v44, %v2667_v39 }
 0x352   :  { %v2697_v15 = vadd.f32 %v3601_v58, %v2668_v24 }
 0x354   :  { %v2713_v26 = vmax.f32 %v2697_v15, 0.0 }
 0x356   :  { %2729 = vst [vmem:[#allocation6 + $0x38] sm:$0xff] %v2713_v26 }
 0x357   :  { %v2670_v7 = vpop.f32.mrf.mxu2 }
 0x358   :  { %v2671_v33 = vadd.f32 %v4839_v44, %v2670_v7 }
 0x35a   :  { %v2698_v11 = vadd.f32 %v3602_v51, %v2671_v33 }
 0x35c   :  { %v2714_v38 = vmax.f32 %v2698_v11, 0.0 }
 0x35e   :  { %2730 = vst [vmem:[#allocation6 + $0x40] sm:$0xff] %v2714_v38 }
 0x35f   :  { %v2672_v6 = vpop.f32.mrf.mxu2 }
 0x360   :  { %v2673_v46 = vadd.f32 %v4839_v44, %v2672_v6 }
 0x362   :  { %v2699_v22 = vadd.f32 %v3603_v59, %v2673_v46 }
 0x364   :  { %v2715_v45 = vmax.f32 %v2699_v22, 0.0 }
 0x366   :  { %2731 = vst [vmem:[#allocation6 + $0x48] sm:$0xff] %v2715_v45 }
 0x367   :  { %v2675_v31 = vpop.f32.mrf.mxu2 }
 0x368   :  { %v2676_v4 = vadd.f32 %v4839_v44, %v2675_v31 }
 0x36a   :  { %v2700_v17 = vadd.f32 %v3604_v21, %v2676_v4 }
 0x36c   :  { %v2716_v37 = vmax.f32 %v2700_v17, 0.0 }
 0x36e   :  { %2732 = vst [vmem:[#allocation6 + $0x50] sm:$0xff] %v2716_v37 }
 0x36f   :  { %v2677_v60 = vpop.f32.mrf.mxu2 }
 0x370   :  { %v2678_v5 = vadd.f32 %v4839_v44, %v2677_v60 }
 0x372   :  { %v2701_v42 = vadd.f32 %v3605_v48, %v2678_v5 }
 0x374   :  { %v2717_v3 = vmax.f32 %v2701_v42, 0.0 }
 0x376   :  { %2733 = vst [vmem:[#allocation6 + $0x58] sm:$0xff] %v2717_v3 }
 0x377   :  { %v2680_v47 = vpop.f32.mrf.mxu2 }
 0x378   :  { %v2681_v43 = vadd.f32 %v4839_v44, %v2680_v47 }
 0x37a   :  { %v2702_v23 = vadd.f32 %v3606_v1, %v2681_v43 }
 0x37c   :  { %v2718_v61 = vmax.f32 %v2702_v23, 0.0 }
 0x37e   :  { %2734 = vst [vmem:[#allocation6 + $0x60] sm:$0xff] %v2718_v61 }
 0x37f   :  { %v2682_v27 = vpop.f32.mrf.mxu2 }
 0x380   :  { %v2683_v30 = vadd.f32 %v4839_v44, %v2682_v27 }
 0x382   :  { %v2703_v55 = vadd.f32 %v3607_v62, %v2683_v30 }
 0x384   :  { %v2719_v19 = vmax.f32 %v2703_v55, 0.0 }
 0x386   :  { %2735 = vst [vmem:[#allocation6 + $0x68] sm:$0xff] %v2719_v19 }
 0x387   :  { %v2685_v0 = vpop.f32.mrf.mxu2 }
 0x388   :  { %v2686_v16 = vadd.f32 %v4839_v44, %v2685_v0 }
 0x38a   :  { %v2704_v53 = vadd.f32 %v3608_v56, %v2686_v16 }
 0x38c   :  { %v2720_v8 = vmax.f32 %v2704_v53, 0.0 }
 0x38e   :  { %2736 = vst [vmem:[#allocation6 + $0x70] sm:$0xff] %v2720_v8 }
 0x38f   :  { %v2687_v32 = vpop.f32.mrf.mxu2 }
 0x390   :  { %v2688_v14 = vadd.f32 %v4839_v44, %v2687_v32 }
 0x392   :  { %v2705_v2 = vadd.f32 %v3609_v52, %v2688_v14 }
 0x394   :  { %v2721_v35 = vmax.f32 %v2705_v2, 0.0 }
 0x396   :  { %2737 = vst [vmem:[#allocation6 + $0x78] sm:$0xff] %v2721_v35 }
 0x397   :  { %2750 = dma.vmem_to_hbm [thread:$0]  %s2743_s7, 2048, %s2745_s8, [#allocation5], %s3667_s25, %s3667_s25, %s3668_s10  }
 0x398   :  { %3660 = dma.done.wait [#allocation5], 2048  }
 0x399   :  { %3661 = vsyncadd [#allocation5], 4294965248 }
 0x39a   :  { %2755 = vsyncpa [#allocation4], 1 }
 0x39b   :  { %2756 = vsyncpa [#allocation5], 1 }

</bundles_post_ra>
